<compile_context>
chip_gen: v7x
topology: tpu7x:2x2x1
jax: 0.10.0
libtpu: 0.0.40
codegen_flags: <defaults>
</compile_context>

<pallas_src>
import functools

import jax
import jax.numpy as jnp
from jax.experimental import pallas as pl
from jax.experimental.pallas import tpu as pltpu


_MAX_TM = 1024                       # cap on the lane tile of the pixel axis
_VMEM_LIMIT = 32 * 1024 * 1024       # fits every generation incl. v7x (64 MiB)


def _round_up(x, m):
    return ((x + m - 1) // m) * m


def _cdiv(a, b):
    return -(-a // b)


def _pixel_tiles(M):
    """(M_pad, TM): lane-dense tiles; >=2 grid steps once the map is large."""
    M_pad = _round_up(M, 128)
    if M_pad <= 256:
        return M_pad, M_pad                      # tiny layer: single block
    TM = min(_MAX_TM, _round_up(_cdiv(M_pad, 2), 128))
    return _round_up(M_pad, TM), TM


def _pad_cols(a, M_pad):
    if a.shape[1] == M_pad:
        return a
    return jnp.pad(a, ((0, 0), (0, M_pad - a.shape[1])))


def _fixed_spec(a):
    return pl.BlockSpec(a.shape, lambda m, _nd=a.ndim: (0,) * _nd)


def _mm_call(kernel_fn, blocked, fixed, out_rows, out_dtypes, M):
    """Run kernel_fn over a 1-D grid tiling the flattened pixel axis.

    blocked: (rows, M) arrays tiled as lane-dense (rows, TM) blocks.
    fixed  : small arrays (weights / biases) passed whole to every grid step.
    Kernel arg order: *blocked, *fixed, *outputs.  Returns list of outputs."""
    M_pad, TM = _pixel_tiles(M)
    blocked = [_pad_cols(a, M_pad) for a in blocked]
    in_specs = ([pl.BlockSpec((a.shape[0], TM), lambda m: (0, m)) for a in blocked]
                + [_fixed_spec(a) for a in fixed])
    out_specs = [pl.BlockSpec((r, TM), lambda m: (0, m)) for r in out_rows]
    out_shapes = [jax.ShapeDtypeStruct((r, M_pad), dt)
                  for r, dt in zip(out_rows, out_dtypes)]
    res = pl.pallas_call(
        kernel_fn,
        out_shape=tuple(out_shapes),
        grid_spec=pltpu.PrefetchScalarGridSpec(
            num_scalar_prefetch=0, grid=(M_pad // TM,),
            in_specs=in_specs, out_specs=out_specs),
        compiler_params=pltpu.CompilerParams(
            dimension_semantics=("parallel",),
            vmem_limit_bytes=_VMEM_LIMIT),
    )(*blocked, *fixed)
    return list(res)


# ----------------------------------------------------------------------------
# Kernels: bf16 storage, f32 matmul/accumulate (f32 x f32 dots only).
# ----------------------------------------------------------------------------
def _f32(x):
    return x.astype(jnp.float32)


def _conv_kernel(p_ref, w_ref, b_ref, o_ref, *, relu):
    r = jnp.dot(w_ref[...], _f32(p_ref[...]), preferred_element_type=jnp.float32)
    r = r + b_ref[...]
    if relu:
        r = jnp.maximum(r, 0.0)
    o_ref[...] = r.astype(o_ref.dtype)


def _convt_skip_kernel(p_ref, m_ref, s_ref, w_ref, b_ref, o_ref):
    # relu(W @ p + b), masked to the F.pad(0,1,0,1) footprint, plus skip map.
    r = jnp.dot(w_ref[...], _f32(p_ref[...]), preferred_element_type=jnp.float32)
    r = jnp.maximum(r + b_ref[...], 0.0)
    o_ref[...] = (r * _f32(m_ref[...]) + _f32(s_ref[...])).astype(o_ref.dtype)


def _dilate_chain_kernel(p_ref, w1_ref, b1_ref, wr_ref, br_ref, s_ref, *, n_rest):
    # dilate1 (taps folded into the contraction) + n_rest pointwise convs;
    # y_dilate_sum accumulated in registers, written once.
    d = jnp.dot(w1_ref[...], _f32(p_ref[...]), preferred_element_type=jnp.float32)
    d = jnp.maximum(d + b1_ref[...], 0.0)
    s = d
    for i in range(n_rest):
        d = jnp.dot(wr_ref[i], d, preferred_element_type=jnp.float32)
        d = jnp.maximum(d + br_ref[i], 0.0)
        s = s + d
    s_ref[...] = s.astype(s_ref.dtype)


def _conv_final_kernel(p_ref, w1_ref, b1_ref, wf_ref, bf_ref, o_ref):
    # relu(up1 conv) chained into the 1x1 finalConv (no ReLU) in one kernel.
    y = jnp.dot(w1_ref[...], _f32(p_ref[...]), preferred_element_type=jnp.float32)
    y = jnp.maximum(y + b1_ref[...], 0.0)
    o_ref[...] = (jnp.dot(wf_ref[...], y, preferred_element_type=jnp.float32)
                  + bf_ref[...]).astype(o_ref.dtype)


# ----------------------------------------------------------------------------
# Conv wrappers (channels-first (C, N, H, W)); tap extraction is XLA glue.
# ----------------------------------------------------------------------------
def _conv_patches(x, KH, KW, stride, padding, dilation):
    """Pad once, take pure strided tap views, drop taps that see only padding.

    Returns (patches (Kc, M) bf16, kept tap indices, Hout, Wout)."""
    Cin, N, H, W = x.shape
    Hout = (H + 2 * padding - dilation * (KH - 1) - 1) // stride + 1
    Wout = (W + 2 * padding - dilation * (KW - 1) - 1) // stride + 1
    M = N * Hout * Wout
    xp = x.astype(jnp.bfloat16)
    if padding:
        xp = jnp.pad(xp, ((0, 0), (0, 0), (padding, padding), (padding, padding)))
    taps, idxs = [], []
    for ky in range(KH):
        r0 = ky * dilation
        r1 = r0 + (Hout - 1) * stride
        if r1 < padding or r0 >= padding + H:
            continue                              # rows all in zero padding
        for kx in range(KW):
            c0 = kx * dilation
            c1 = c0 + (Wout - 1) * stride
            if c1 < padding or c0 >= padding + W:
                continue                          # cols all in zero padding
            v = xp[:, :, r0:r1 + 1:stride, c0:c1 + 1:stride]
            taps.append(v.reshape(Cin, M))
            idxs.append((ky, kx))
    # TODO(synk): move this gather in-kernel (DMA padded row slabs + pl.ds)
    # to avoid materializing the (Kc, M) patches tensor in HBM.
    return jnp.concatenate(taps, axis=0), idxs, Hout, Wout


def _tap_weight(w, idxs):
    # w: (KH, KW, Cin, Cout) -> (Cout, Kc), same tap order as the patches.
    return jnp.transpose(jnp.concatenate([w[ky, kx] for ky, kx in idxs], axis=0))


def conv2d(x, w, b, *, stride=1, padding=0, dilation=1, relu=True,
           out_dtype=jnp.bfloat16):
    """x: (Cin, N, H, W); w: (KH, KW, Cin, Cout); b: (Cout,)."""
    KH, KW, _, Cout = w.shape
    N = x.shape[1]
    patches, idxs, Hout, Wout = _conv_patches(x, KH, KW, stride, padding, dilation)
    M = N * Hout * Wout
    out = _mm_call(functools.partial(_conv_kernel, relu=relu),
                   [patches], [_tap_weight(w, idxs), b.reshape(Cout, 1)],
                   [Cout], [out_dtype], M)[0]
    return out[:, :M].reshape(Cout, N, Hout, Wout)


def dilate_layers(x, p):
    """dilate1..dilate6 and y_dilate_sum.

    When every dilation (2..32) covers the map extent (true after 3 stride-2
    stages at typical sizes), dilate2..6 are pointwise convs and the full
    chain + running sum runs in ONE pallas_call.  General fallback otherwise."""
    Cin, N, H, W = x.shape
    C8 = p["dilate1"][0].shape[-1]
    dils = (1, 2, 4, 8, 16, 32)
    if all(d >= H and d >= W for d in dils[1:]):
        patches, idxs, Ho, Wo = _conv_patches(x, 3, 3, 1, 1, 1)
        M = N * Ho * Wo
        w1_t = _tap_weight(p["dilate1"][0], idxs)
        b1 = p["dilate1"][1].reshape(C8, 1)
        wr = jnp.stack([jnp.transpose(p[f"dilate{i}"][0][1, 1]) for i in range(2, 7)])
        br = jnp.stack([p[f"dilate{i}"][1].reshape(C8, 1) for i in range(2, 7)])
        s = _mm_call(functools.partial(_dilate_chain_kernel, n_rest=5),
                     [patches], [w1_t, b1, wr, br], [C8], [jnp.bfloat16], M)[0]
        return s[:, :M].reshape(C8, N, Ho, Wo)
    # Fallback for small dilations relative to the map: per-layer convs.
    d = conv2d(x, *p["dilate1"], padding=1, dilation=1)
    s = d.astype(jnp.float32)
    for i, dd in ((2, 2), (3, 4), (4, 8), (5, 16), (6, 32)):
        d = conv2d(d, *p[f"dilate{i}"], padding=dd, dilation=dd)
        s = s + d.astype(jnp.float32)
    return s.astype(jnp.bfloat16)


_PHASES = ((0, 0), (0, 1), (1, 0), (1, 1))    # output sub-pixel phases (py, px)
_TAPS2 = ((0, 0), (0, 1), (1, 0), (1, 1))     # input offsets (dy, dx)


def conv_transpose_pad_skip(x, w, b, skip):
    """F.pad(relu(ConvTranspose2d(k=3,s=2,p=1)(x)), (0,1,0,1)) + skip,
    all four sub-pixel phases fused into ONE matmul kernel.

    x: (Cin, N, H, W); w: (Cin, Cout, 3, 3); b: (Cout,); skip: (Cout, N, 2H, 2W).
    Returns (Cout, N, 2H, 2W) bf16."""
    Cin, N, H, W = x.shape
    Cout = w.shape[1]
    M = N * H * W

    # Shared 2x2-tap im2col on x padded by one row/col at bottom/right.
    xp = jnp.pad(x.astype(jnp.bfloat16), ((0, 0), (0, 0), (0, 1), (0, 1)))
    patches = jnp.concatenate(
        [xp[:, :, dy:dy + H, dx:dx + W].reshape(Cin, M) for dy, dx in _TAPS2],
        axis=0)                                               # (4*Cin, M)

    # Combined phase weight (4*Cout, 4*Cin); zero blocks for unused taps.
    wk = jnp.transpose(w, (2, 3, 1, 0))                       # (ky, kx, Cout, Cin)
    zblk = jnp.zeros((Cout, Cin), w.dtype)
    rows = []
    for py, px in _PHASES:
        blks = []
        for dy, dx in _TAPS2:
            ky, kx = py + 1 - 2 * dy, px + 1 - 2 * dx
            blks.append(wk[ky, kx] if (0 <= ky <= 2 and 0 <= kx <= 2) else zblk)
        rows.append(jnp.concatenate(blks, axis=1))
    w_comb = jnp.concatenate(rows, axis=0)                    # (4*Cout, 4*Cin)
    b_comb = jnp.tile(b.reshape(1, Cout), (4, 1)).reshape(4 * Cout, 1)

    # Per-phase validity mask: zero where F.pad(0,1,0,1) supplies the value.
    in_col = (jnp.arange(W) < W - 1).astype(jnp.float32)[None, :]
    in_row = (jnp.arange(H) < H - 1).astype(jnp.float32)[:, None]
    ones = jnp.ones((H, W), jnp.float32)
    mask4 = jnp.stack([ones, ones * in_col, ones * in_row, ones * in_row * in_col])
    mask = jnp.broadcast_to(mask4[:, None, None], (4, Cout, N, H, W))
    mask = mask.reshape(4 * Cout, M).astype(jnp.bfloat16)     # constant folded

    # Skip map de-interleaved into the same (phase, Cout, pixel) layout.
    skip_ph = (skip.reshape(Cout, N, H, 2, W, 2)
               .transpose(3, 5, 0, 1, 2, 4).reshape(4 * Cout, M))

    out = _mm_call(_convt_skip_kernel, [patches, mask, skip_ph],
                   [w_comb, b_comb], [4 * Cout], [jnp.bfloat16], M)[0]
    out = out[:, :M].reshape(2, 2, Cout, N, H, W)
    return out.transpose(2, 3, 4, 0, 5, 1).reshape(Cout, N, 2 * H, 2 * W)


def conv_up1_final(x, w1, b1, wf, bf):
    """relu(up1 3x3 conv) chained with the 1x1 finalConv in one kernel (f32 out)."""
    KH, KW, _, C1 = w1.shape
    Cout = wf.shape[-1]
    N = x.shape[1]
    patches, idxs, Hout, Wout = _conv_patches(x, KH, KW, 1, 1, 1)
    M = N * Hout * Wout
    out = _mm_call(_conv_final_kernel, [patches],
                   [_tap_weight(w1, idxs), b1.reshape(C1, 1),
                    jnp.transpose(wf[0, 0]), bf.reshape(Cout, 1)],
                   [Cout], [jnp.float32], M)[0]
    return out[:, :M].reshape(Cout, N, Hout, Wout)


# ----------------------------------------------------------------------------
# Parameter init (deterministic, PyTorch-like uniform bounds).
# ----------------------------------------------------------------------------
def _init_conv(key, kh, kw, cin, cout):
    k1, k2 = jax.random.split(key)
    bound = 1.0 / float(cin * kh * kw) ** 0.5
    w = jax.random.uniform(k1, (kh, kw, cin, cout), jnp.float32, -bound, bound)
    b = jax.random.uniform(k2, (cout,), jnp.float32, -bound, bound)
    return w, b


def _init_convT(key, cin, cout, kh, kw):
    k1, k2 = jax.random.split(key)
    bound = 1.0 / float(cout * kh * kw) ** 0.5
    w = jax.random.uniform(k1, (cin, cout, kh, kw), jnp.float32, -bound, bound)
    b = jax.random.uniform(k2, (cout,), jnp.float32, -bound, bound)
    return w, b


def init_params(key, dIn, dOut, NF):
    names_conv = [
        ("down1", 3, dIn, NF), ("down1pool", 3, NF, NF),
        ("down2", 3, NF, NF * 2), ("down2pool", 3, NF * 2, NF * 2),
        ("down3", 3, NF * 2, NF * 4), ("down3pool", 3, NF * 4, NF * 4),
        ("dilate1", 3, NF * 4, NF * 8), ("dilate2", 3, NF * 8, NF * 8),
        ("dilate3", 3, NF * 8, NF * 8), ("dilate4", 3, NF * 8, NF * 8),
        ("dilate5", 3, NF * 8, NF * 8), ("dilate6", 3, NF * 8, NF * 8),
        ("up3", 3, NF * 4, NF * 4), ("up2", 3, NF * 2, NF * 2),
        ("up1", 3, NF, NF), ("finalConv", 1, NF, dOut),
    ]
    names_tr = [
        ("up3_tr", NF * 8, NF * 4), ("up2_tr", NF * 4, NF * 2),
        ("up1_tr", NF * 2, NF),
    ]
    keys = jax.random.split(key, len(names_conv) + len(names_tr))
    params = {}
    for (name, ks, cin, cout), k in zip(names_conv, keys[:len(names_conv)]):
        params[name] = _init_conv(k, ks, ks, cin, cout)
    for (name, cin, cout), k in zip(names_tr, keys[len(names_conv):]):
        params[name] = _init_convT(k, cin, cout, 3, 3)
    return params


# ----------------------------------------------------------------------------
# Forward pass (NCHW in / NCHW out, matching the PyTorch module).
# ----------------------------------------------------------------------------
def unet_tiny_sum_forward(x_nchw, p):
    x = jnp.transpose(x_nchw, (1, 0, 2, 3))         # NCHW -> (C, N, H, W)

    y1 = conv2d(x, *p["down1"], padding=1)
    y1p = conv2d(y1, *p["down1pool"], padding=1, stride=2)
    y2 = conv2d(y1p, *p["down2"], padding=1)
    y2p = conv2d(y2, *p["down2pool"], padding=1, stride=2)
    y3 = conv2d(y2p, *p["down3"], padding=1)
    y3p = conv2d(y3, *p["down3pool"], padding=1, stride=2)

    d_sum = dilate_layers(y3p, p)                    # fused 6-conv chain + sum

    u3t = conv_transpose_pad_skip(d_sum, *p["up3_tr"], y3)   # convT+pad+skip
    u3 = conv2d(u3t, *p["up3"], padding=1)
    u2t = conv_transpose_pad_skip(u3, *p["up2_tr"], y2)
    u2 = conv2d(u2t, *p["up2"], padding=1)
    u1t = conv_transpose_pad_skip(u2, *p["up1_tr"], y1)

    y_final = conv_up1_final(u1t, *p["up1"], *p["finalConv"])
    return jnp.transpose(y_final, (1, 0, 2, 3))      # -> NCHW


if __name__ == "__main__":
    dIn, dOut, NF = 4, 2, 4
    N, H, W = 2, 16, 16

    key = jax.random.PRNGKey(0)
    kx, kp = jax.random.split(key)
    x = jax.random.normal(kx, (N, dIn, H, W), jnp.float32)
    params = init_params(kp, dIn, dOut, NF)

    fwd = jax.jit(unet_tiny_sum_forward)
    out = fwd(x, params)
    jax.block_until_ready(out)
    assert out.shape == (N, dOut, H, W), out.shape
    print("KERNEL_OK")
</pallas_src>

<mosaic_0001>
module attributes {stable_mosaic.version = 11 : i64} {
  func.func @_conv_kernel(%arg0: i32, %arg1: memref<36x256xbf16, #tpu.memory_space<vmem>>, %arg2: memref<4x36xf32, #tpu.memory_space<vmem>>, %arg3: memref<4x1xf32, #tpu.memory_space<vmem>>, %arg4: memref<4x256xbf16, #tpu.memory_space<vmem>>) attributes {dimension_semantics = [#tpu.dimension_semantics<parallel>], iteration_bounds = array<i64: 2>, scalar_prefetch = 0 : i64, scratch_operands = 0 : i64, tpu.core_type = #tpu.core_type<tc>, window_params = [{transform_indices = @transform_0, window_bounds = array<i64: 36, 256>}, {pipeline_mode = #tpu.pipeline_mode<synchronous>, transform_indices = @transform_1, window_bounds = array<i64: 4, 36>}, {pipeline_mode = #tpu.pipeline_mode<synchronous>, transform_indices = @transform_2, window_bounds = array<i64: 4, 1>}, {transform_indices = @transform_3, window_bounds = array<i64: 4, 256>}]} {
    %c0 = arith.constant 0 : index
    %c0_0 = arith.constant 0 : index
    %0 = vector.load %arg2[%c0, %c0_0] : memref<4x36xf32, #tpu.memory_space<vmem>>, vector<4x36xf32>
    %c0_1 = arith.constant 0 : index
    %c0_2 = arith.constant 0 : index
    %1 = vector.load %arg1[%c0_1, %c0_2] : memref<36x256xbf16, #tpu.memory_space<vmem>>, vector<36x256xbf16>
    %2 = arith.extf %1 : vector<36x256xbf16> to vector<36x256xf32>
    %cst = arith.constant dense<0.000000e+00> : vector<4x256xf32>
    %3 = tpu.matmul %0, %2, %cst {dimension_numbers = #tpu.dot_dimension_numbers<[1], [0], [0], [1], [0, 0, 1, 1], [], []>} : vector<4x36xf32>, vector<36x256xf32>, vector<4x256xf32> -> vector<4x256xf32>
    %c0_3 = arith.constant 0 : index
    %c0_4 = arith.constant 0 : index
    %4 = vector.load %arg3[%c0_3, %c0_4] : memref<4x1xf32, #tpu.memory_space<vmem>>, vector<4x1xf32>
    %5 = vector.broadcast %4 : vector<4x1xf32> to vector<4x256xf32>
    %6 = arith.addf %3, %5 : vector<4x256xf32>
    %cst_5 = arith.constant 0.000000e+00 : f32
    %7 = vector.broadcast %cst_5 : f32 to vector<4x256xf32>
    %8 = arith.maximumf %6, %7 : vector<4x256xf32>
    %9 = arith.truncf %8 : vector<4x256xf32> to vector<4x256xbf16>
    %c0_6 = arith.constant 0 : index
    %c0_7 = arith.constant 0 : index
    %10 = vector.load %arg4[%c0_6, %c0_7] : memref<4x256xbf16, #tpu.memory_space<vmem>>, vector<4x256xbf16>
    tpu.vector_store %arg4[%c0_6, %c0_7], %9 {strides = array<i32>} : memref<4x256xbf16, #tpu.memory_space<vmem>>, vector<4x256xbf16>,
    return
  }
  func.func @transform_0(%arg0: i32) -> (i32, i32) {
    %c0_i32 = arith.constant 0 : i32
    %c0_i32_0 = arith.constant 0 : i32
    return %c0_i32, %arg0 : i32, i32
  }
  func.func @transform_1(%arg0: i32) -> (i32, i32) {
    %c0_i32 = arith.constant 0 : i32
    %c0_i32_0 = arith.constant 0 : i32
    %c0_i32_1 = arith.constant 0 : i32
    return %c0_i32, %c0_i32_0 : i32, i32
  }
  func.func @transform_2(%arg0: i32) -> (i32, i32) {
    %c0_i32 = arith.constant 0 : i32
    %c0_i32_0 = arith.constant 0 : i32
    %c0_i32_1 = arith.constant 0 : i32
    return %c0_i32, %c0_i32_0 : i32, i32
  }
  func.func @transform_3(%arg0: i32) -> (i32, i32) {
    %c0_i32 = arith.constant 0 : i32
    %c0_i32_0 = arith.constant 0 : i32
    return %c0_i32, %arg0 : i32, i32
  }
}

module attributes {stable_mosaic.version = 11 : i64} {
  func.func @_conv_kernel(%arg0: i32, %arg1: memref<36x128xbf16, #tpu.memory_space<vmem>>, %arg2: memref<4x36xf32, #tpu.memory_space<vmem>>, %arg3: memref<4x1xf32, #tpu.memory_space<vmem>>, %arg4: memref<4x128xbf16, #tpu.memory_space<vmem>>) attributes {dimension_semantics = [#tpu.dimension_semantics<parallel>], iteration_bounds = array<i64: 1>, scalar_prefetch = 0 : i64, scratch_operands = 0 : i64, tpu.core_type = #tpu.core_type<tc>, window_params = [{transform_indices = @transform_0, window_bounds = array<i64: 36, 128>}, {pipeline_mode = #tpu.pipeline_mode<synchronous>, transform_indices = @transform_1, window_bounds = array<i64: 4, 36>}, {pipeline_mode = #tpu.pipeline_mode<synchronous>, transform_indices = @transform_2, window_bounds = array<i64: 4, 1>}, {transform_indices = @transform_3, window_bounds = array<i64: 4, 128>}]} {
    %c0 = arith.constant 0 : index
    %c0_0 = arith.constant 0 : index
    %0 = vector.load %arg2[%c0, %c0_0] : memref<4x36xf32, #tpu.memory_space<vmem>>, vector<4x36xf32>
    %c0_1 = arith.constant 0 : index
    %c0_2 = arith.constant 0 : index
    %1 = vector.load %arg1[%c0_1, %c0_2] : memref<36x128xbf16, #tpu.memory_space<vmem>>, vector<36x128xbf16>
    %2 = arith.extf %1 : vector<36x128xbf16> to vector<36x128xf32>
    %cst = arith.constant dense<0.000000e+00> : vector<4x128xf32>
    %3 = tpu.matmul %0, %2, %cst {dimension_numbers = #tpu.dot_dimension_numbers<[1], [0], [0], [1], [0, 0, 1, 1], [], []>} : vector<4x36xf32>, vector<36x128xf32>, vector<4x128xf32> -> vector<4x128xf32>
    %c0_3 = arith.constant 0 : index
    %c0_4 = arith.constant 0 : index
    %4 = vector.load %arg3[%c0_3, %c0_4] : memref<4x1xf32, #tpu.memory_space<vmem>>, vector<4x1xf32>
    %5 = vector.broadcast %4 : vector<4x1xf32> to vector<4x128xf32>
    %6 = arith.addf %3, %5 : vector<4x128xf32>
    %cst_5 = arith.constant 0.000000e+00 : f32
    %7 = vector.broadcast %cst_5 : f32 to vector<4x128xf32>
    %8 = arith.maximumf %6, %7 : vector<4x128xf32>
    %9 = arith.truncf %8 : vector<4x128xf32> to vector<4x128xbf16>
    %c0_6 = arith.constant 0 : index
    %c0_7 = arith.constant 0 : index
    %10 = vector.load %arg4[%c0_6, %c0_7] : memref<4x128xbf16, #tpu.memory_space<vmem>>, vector<4x128xbf16>
    tpu.vector_store %arg4[%c0_6, %c0_7], %9 {strides = array<i32>} : memref<4x128xbf16, #tpu.memory_space<vmem>>, vector<4x128xbf16>,
    return
  }
  func.func @transform_0(%arg0: i32) -> (i32, i32) {
    %c0_i32 = arith.constant 0 : i32
    %c0_i32_0 = arith.constant 0 : i32
    return %c0_i32, %arg0 : i32, i32
  }
  func.func @transform_1(%arg0: i32) -> (i32, i32) {
    %c0_i32 = arith.constant 0 : i32
    %c0_i32_0 = arith.constant 0 : i32
    %c0_i32_1 = arith.constant 0 : i32
    return %c0_i32, %c0_i32_0 : i32, i32
  }
  func.func @transform_2(%arg0: i32) -> (i32, i32) {
    %c0_i32 = arith.constant 0 : i32
    %c0_i32_0 = arith.constant 0 : i32
    %c0_i32_1 = arith.constant 0 : i32
    return %c0_i32, %c0_i32_0 : i32, i32
  }
  func.func @transform_3(%arg0: i32) -> (i32, i32) {
    %c0_i32 = arith.constant 0 : i32
    %c0_i32_0 = arith.constant 0 : i32
    return %c0_i32, %arg0 : i32, i32
  }
}

module attributes {stable_mosaic.version = 11 : i64} {
  func.func @_conv_kernel(%arg0: i32, %arg1: memref<36x128xbf16, #tpu.memory_space<vmem>>, %arg2: memref<8x36xf32, #tpu.memory_space<vmem>>, %arg3: memref<8x1xf32, #tpu.memory_space<vmem>>, %arg4: memref<8x128xbf16, #tpu.memory_space<vmem>>) attributes {dimension_semantics = [#tpu.dimension_semantics<parallel>], iteration_bounds = array<i64: 1>, scalar_prefetch = 0 : i64, scratch_operands = 0 : i64, tpu.core_type = #tpu.core_type<tc>, window_params = [{transform_indices = @transform_0, window_bounds = array<i64: 36, 128>}, {pipeline_mode = #tpu.pipeline_mode<synchronous>, transform_indices = @transform_1, window_bounds = array<i64: 8, 36>}, {pipeline_mode = #tpu.pipeline_mode<synchronous>, transform_indices = @transform_2, window_bounds = array<i64: 8, 1>}, {transform_indices = @transform_3, window_bounds = array<i64: 8, 128>}]} {
    %c0 = arith.constant 0 : index
    %c0_0 = arith.constant 0 : index
    %0 = vector.load %arg2[%c0, %c0_0] : memref<8x36xf32, #tpu.memory_space<vmem>>, vector<8x36xf32>
    %c0_1 = arith.constant 0 : index
    %c0_2 = arith.constant 0 : index
    %1 = vector.load %arg1[%c0_1, %c0_2] : memref<36x128xbf16, #tpu.memory_space<vmem>>, vector<36x128xbf16>
    %2 = arith.extf %1 : vector<36x128xbf16> to vector<36x128xf32>
    %cst = arith.constant dense<0.000000e+00> : vector<8x128xf32>
    %3 = tpu.matmul %0, %2, %cst {dimension_numbers = #tpu.dot_dimension_numbers<[1], [0], [0], [1], [0, 0, 1, 1], [], []>} : vector<8x36xf32>, vector<36x128xf32>, vector<8x128xf32> -> vector<8x128xf32>
    %c0_3 = arith.constant 0 : index
    %c0_4 = arith.constant 0 : index
    %4 = vector.load %arg3[%c0_3, %c0_4] : memref<8x1xf32, #tpu.memory_space<vmem>>, vector<8x1xf32>
    %5 = vector.broadcast %4 : vector<8x1xf32> to vector<8x128xf32>
    %6 = arith.addf %3, %5 : vector<8x128xf32>
    %cst_5 = arith.constant 0.000000e+00 : f32
    %7 = vector.broadcast %cst_5 : f32 to vector<8x128xf32>
    %8 = arith.maximumf %6, %7 : vector<8x128xf32>
    %9 = arith.truncf %8 : vector<8x128xf32> to vector<8x128xbf16>
    %c0_6 = arith.constant 0 : index
    %c0_7 = arith.constant 0 : index
    %10 = vector.load %arg4[%c0_6, %c0_7] : memref<8x128xbf16, #tpu.memory_space<vmem>>, vector<8x128xbf16>
    tpu.vector_store %arg4[%c0_6, %c0_7], %9 {strides = array<i32>} : memref<8x128xbf16, #tpu.memory_space<vmem>>, vector<8x128xbf16>,
    return
  }
  func.func @transform_0(%arg0: i32) -> (i32, i32) {
    %c0_i32 = arith.constant 0 : i32
    %c0_i32_0 = arith.constant 0 : i32
    return %c0_i32, %arg0 : i32, i32
  }
  func.func @transform_1(%arg0: i32) -> (i32, i32) {
    %c0_i32 = arith.constant 0 : i32
    %c0_i32_0 = arith.constant 0 : i32
    %c0_i32_1 = arith.constant 0 : i32
    return %c0_i32, %c0_i32_0 : i32, i32
  }
  func.func @transform_2(%arg0: i32) -> (i32, i32) {
    %c0_i32 = arith.constant 0 : i32
    %c0_i32_0 = arith.constant 0 : i32
    %c0_i32_1 = arith.constant 0 : i32
    return %c0_i32, %c0_i32_0 : i32, i32
  }
  func.func @transform_3(%arg0: i32) -> (i32, i32) {
    %c0_i32 = arith.constant 0 : i32
    %c0_i32_0 = arith.constant 0 : i32
    return %c0_i32, %arg0 : i32, i32
  }
}

module attributes {stable_mosaic.version = 11 : i64} {
  func.func @_conv_kernel(%arg0: i32, %arg1: memref<72x128xbf16, #tpu.memory_space<vmem>>, %arg2: memref<8x72xf32, #tpu.memory_space<vmem>>, %arg3: memref<8x1xf32, #tpu.memory_space<vmem>>, %arg4: memref<8x128xbf16, #tpu.memory_space<vmem>>) attributes {dimension_semantics = [#tpu.dimension_semantics<parallel>], iteration_bounds = array<i64: 1>, scalar_prefetch = 0 : i64, scratch_operands = 0 : i64, tpu.core_type = #tpu.core_type<tc>, window_params = [{transform_indices = @transform_0, window_bounds = array<i64: 72, 128>}, {pipeline_mode = #tpu.pipeline_mode<synchronous>, transform_indices = @transform_1, window_bounds = array<i64: 8, 72>}, {pipeline_mode = #tpu.pipeline_mode<synchronous>, transform_indices = @transform_2, window_bounds = array<i64: 8, 1>}, {transform_indices = @transform_3, window_bounds = array<i64: 8, 128>}]} {
    %c0 = arith.constant 0 : index
    %c0_0 = arith.constant 0 : index
    %0 = vector.load %arg2[%c0, %c0_0] : memref<8x72xf32, #tpu.memory_space<vmem>>, vector<8x72xf32>
    %c0_1 = arith.constant 0 : index
    %c0_2 = arith.constant 0 : index
    %1 = vector.load %arg1[%c0_1, %c0_2] : memref<72x128xbf16, #tpu.memory_space<vmem>>, vector<72x128xbf16>
    %2 = arith.extf %1 : vector<72x128xbf16> to vector<72x128xf32>
    %cst = arith.constant dense<0.000000e+00> : vector<8x128xf32>
    %3 = tpu.matmul %0, %2, %cst {dimension_numbers = #tpu.dot_dimension_numbers<[1], [0], [0], [1], [0, 0, 1, 1], [], []>} : vector<8x72xf32>, vector<72x128xf32>, vector<8x128xf32> -> vector<8x128xf32>
    %c0_3 = arith.constant 0 : index
    %c0_4 = arith.constant 0 : index
    %4 = vector.load %arg3[%c0_3, %c0_4] : memref<8x1xf32, #tpu.memory_space<vmem>>, vector<8x1xf32>
    %5 = vector.broadcast %4 : vector<8x1xf32> to vector<8x128xf32>
    %6 = arith.addf %3, %5 : vector<8x128xf32>
    %cst_5 = arith.constant 0.000000e+00 : f32
    %7 = vector.broadcast %cst_5 : f32 to vector<8x128xf32>
    %8 = arith.maximumf %6, %7 : vector<8x128xf32>
    %9 = arith.truncf %8 : vector<8x128xf32> to vector<8x128xbf16>
    %c0_6 = arith.constant 0 : index
    %c0_7 = arith.constant 0 : index
    %10 = vector.load %arg4[%c0_6, %c0_7] : memref<8x128xbf16, #tpu.memory_space<vmem>>, vector<8x128xbf16>
    tpu.vector_store %arg4[%c0_6, %c0_7], %9 {strides = array<i32>} : memref<8x128xbf16, #tpu.memory_space<vmem>>, vector<8x128xbf16>,
    return
  }
  func.func @transform_0(%arg0: i32) -> (i32, i32) {
    %c0_i32 = arith.constant 0 : i32
    %c0_i32_0 = arith.constant 0 : i32
    return %c0_i32, %arg0 : i32, i32
  }
  func.func @transform_1(%arg0: i32) -> (i32, i32) {
    %c0_i32 = arith.constant 0 : i32
    %c0_i32_0 = arith.constant 0 : i32
    %c0_i32_1 = arith.constant 0 : i32
    return %c0_i32, %c0_i32_0 : i32, i32
  }
  func.func @transform_2(%arg0: i32) -> (i32, i32) {
    %c0_i32 = arith.constant 0 : i32
    %c0_i32_0 = arith.constant 0 : i32
    %c0_i32_1 = arith.constant 0 : i32
    return %c0_i32, %c0_i32_0 : i32, i32
  }
  func.func @transform_3(%arg0: i32) -> (i32, i32) {
    %c0_i32 = arith.constant 0 : i32
    %c0_i32_0 = arith.constant 0 : i32
    return %c0_i32, %arg0 : i32, i32
  }
}

module attributes {stable_mosaic.version = 11 : i64} {
  func.func @_conv_kernel(%arg0: i32, %arg1: memref<72x128xbf16, #tpu.memory_space<vmem>>, %arg2: memref<16x72xf32, #tpu.memory_space<vmem>>, %arg3: memref<16x1xf32, #tpu.memory_space<vmem>>, %arg4: memref<16x128xbf16, #tpu.memory_space<vmem>>) attributes {dimension_semantics = [#tpu.dimension_semantics<parallel>], iteration_bounds = array<i64: 1>, scalar_prefetch = 0 : i64, scratch_operands = 0 : i64, tpu.core_type = #tpu.core_type<tc>, window_params = [{transform_indices = @transform_0, window_bounds = array<i64: 72, 128>}, {pipeline_mode = #tpu.pipeline_mode<synchronous>, transform_indices = @transform_1, window_bounds = array<i64: 16, 72>}, {pipeline_mode = #tpu.pipeline_mode<synchronous>, transform_indices = @transform_2, window_bounds = array<i64: 16, 1>}, {transform_indices = @transform_3, window_bounds = array<i64: 16, 128>}]} {
    %c0 = arith.constant 0 : index
    %c0_0 = arith.constant 0 : index
    %0 = vector.load %arg2[%c0, %c0_0] : memref<16x72xf32, #tpu.memory_space<vmem>>, vector<16x72xf32>
    %c0_1 = arith.constant 0 : index
    %c0_2 = arith.constant 0 : index
    %1 = vector.load %arg1[%c0_1, %c0_2] : memref<72x128xbf16, #tpu.memory_space<vmem>>, vector<72x128xbf16>
    %2 = arith.extf %1 : vector<72x128xbf16> to vector<72x128xf32>
    %cst = arith.constant dense<0.000000e+00> : vector<16x128xf32>
    %3 = tpu.matmul %0, %2, %cst {dimension_numbers = #tpu.dot_dimension_numbers<[1], [0], [0], [1], [0, 0, 1, 1], [], []>} : vector<16x72xf32>, vector<72x128xf32>, vector<16x128xf32> -> vector<16x128xf32>
    %c0_3 = arith.constant 0 : index
    %c0_4 = arith.constant 0 : index
    %4 = vector.load %arg3[%c0_3, %c0_4] : memref<16x1xf32, #tpu.memory_space<vmem>>, vector<16x1xf32>
    %5 = vector.broadcast %4 : vector<16x1xf32> to vector<16x128xf32>
    %6 = arith.addf %3, %5 : vector<16x128xf32>
    %cst_5 = arith.constant 0.000000e+00 : f32
    %7 = vector.broadcast %cst_5 : f32 to vector<16x128xf32>
    %8 = arith.maximumf %6, %7 : vector<16x128xf32>
    %9 = arith.truncf %8 : vector<16x128xf32> to vector<16x128xbf16>
    %c0_6 = arith.constant 0 : index
    %c0_7 = arith.constant 0 : index
    %10 = vector.load %arg4[%c0_6, %c0_7] : memref<16x128xbf16, #tpu.memory_space<vmem>>, vector<16x128xbf16>
    tpu.vector_store %arg4[%c0_6, %c0_7], %9 {strides = array<i32>} : memref<16x128xbf16, #tpu.memory_space<vmem>>, vector<16x128xbf16>,
    return
  }
  func.func @transform_0(%arg0: i32) -> (i32, i32) {
    %c0_i32 = arith.constant 0 : i32
    %c0_i32_0 = arith.constant 0 : i32
    return %c0_i32, %arg0 : i32, i32
  }
  func.func @transform_1(%arg0: i32) -> (i32, i32) {
    %c0_i32 = arith.constant 0 : i32
    %c0_i32_0 = arith.constant 0 : i32
    %c0_i32_1 = arith.constant 0 : i32
    return %c0_i32, %c0_i32_0 : i32, i32
  }
  func.func @transform_2(%arg0: i32) -> (i32, i32) {
    %c0_i32 = arith.constant 0 : i32
    %c0_i32_0 = arith.constant 0 : i32
    %c0_i32_1 = arith.constant 0 : i32
    return %c0_i32, %c0_i32_0 : i32, i32
  }
  func.func @transform_3(%arg0: i32) -> (i32, i32) {
    %c0_i32 = arith.constant 0 : i32
    %c0_i32_0 = arith.constant 0 : i32
    return %c0_i32, %arg0 : i32, i32
  }
}

module attributes {stable_mosaic.version = 11 : i64} {
  func.func @_conv_kernel(%arg0: i32, %arg1: memref<144x128xbf16, #tpu.memory_space<vmem>>, %arg2: memref<16x144xf32, #tpu.memory_space<vmem>>, %arg3: memref<16x1xf32, #tpu.memory_space<vmem>>, %arg4: memref<16x128xbf16, #tpu.memory_space<vmem>>) attributes {dimension_semantics = [#tpu.dimension_semantics<parallel>], iteration_bounds = array<i64: 1>, scalar_prefetch = 0 : i64, scratch_operands = 0 : i64, tpu.core_type = #tpu.core_type<tc>, window_params = [{transform_indices = @transform_0, window_bounds = array<i64: 144, 128>}, {pipeline_mode = #tpu.pipeline_mode<synchronous>, transform_indices = @transform_1, window_bounds = array<i64: 16, 144>}, {pipeline_mode = #tpu.pipeline_mode<synchronous>, transform_indices = @transform_2, window_bounds = array<i64: 16, 1>}, {transform_indices = @transform_3, window_bounds = array<i64: 16, 128>}]} {
    %c0 = arith.constant 0 : index
    %c0_0 = arith.constant 0 : index
    %0 = vector.load %arg2[%c0, %c0_0] : memref<16x144xf32, #tpu.memory_space<vmem>>, vector<16x144xf32>
    %c0_1 = arith.constant 0 : index
    %c0_2 = arith.constant 0 : index
    %1 = vector.load %arg1[%c0_1, %c0_2] : memref<144x128xbf16, #tpu.memory_space<vmem>>, vector<144x128xbf16>
    %2 = arith.extf %1 : vector<144x128xbf16> to vector<144x128xf32>
    %cst = arith.constant dense<0.000000e+00> : vector<16x128xf32>
    %3 = tpu.matmul %0, %2, %cst {dimension_numbers = #tpu.dot_dimension_numbers<[1], [0], [0], [1], [0, 0, 1, 1], [], []>} : vector<16x144xf32>, vector<144x128xf32>, vector<16x128xf32> -> vector<16x128xf32>
    %c0_3 = arith.constant 0 : index
    %c0_4 = arith.constant 0 : index
    %4 = vector.load %arg3[%c0_3, %c0_4] : memref<16x1xf32, #tpu.memory_space<vmem>>, vector<16x1xf32>
    %5 = vector.broadcast %4 : vector<16x1xf32> to vector<16x128xf32>
    %6 = arith.addf %3, %5 : vector<16x128xf32>
    %cst_5 = arith.constant 0.000000e+00 : f32
    %7 = vector.broadcast %cst_5 : f32 to vector<16x128xf32>
    %8 = arith.maximumf %6, %7 : vector<16x128xf32>
    %9 = arith.truncf %8 : vector<16x128xf32> to vector<16x128xbf16>
    %c0_6 = arith.constant 0 : index
    %c0_7 = arith.constant 0 : index
    %10 = vector.load %arg4[%c0_6, %c0_7] : memref<16x128xbf16, #tpu.memory_space<vmem>>, vector<16x128xbf16>
    tpu.vector_store %arg4[%c0_6, %c0_7], %9 {strides = array<i32>} : memref<16x128xbf16, #tpu.memory_space<vmem>>, vector<16x128xbf16>,
    return
  }
  func.func @transform_0(%arg0: i32) -> (i32, i32) {
    %c0_i32 = arith.constant 0 : i32
    %c0_i32_0 = arith.constant 0 : i32
    return %c0_i32, %arg0 : i32, i32
  }
  func.func @transform_1(%arg0: i32) -> (i32, i32) {
    %c0_i32 = arith.constant 0 : i32
    %c0_i32_0 = arith.constant 0 : i32
    %c0_i32_1 = arith.constant 0 : i32
    return %c0_i32, %c0_i32_0 : i32, i32
  }
  func.func @transform_2(%arg0: i32) -> (i32, i32) {
    %c0_i32 = arith.constant 0 : i32
    %c0_i32_0 = arith.constant 0 : i32
    %c0_i32_1 = arith.constant 0 : i32
    return %c0_i32, %c0_i32_0 : i32, i32
  }
  func.func @transform_3(%arg0: i32) -> (i32, i32) {
    %c0_i32 = arith.constant 0 : i32
    %c0_i32_0 = arith.constant 0 : i32
    return %c0_i32, %arg0 : i32, i32
  }
}

module attributes {stable_mosaic.version = 11 : i64} {
  func.func @_dilate_chain_kernel(%arg0: i32, %arg1: memref<144x128xbf16, #tpu.memory_space<vmem>>, %arg2: memref<32x144xf32, #tpu.memory_space<vmem>>, %arg3: memref<32x1xf32, #tpu.memory_space<vmem>>, %arg4: memref<5x32x32xf32, #tpu.memory_space<vmem>>, %arg5: memref<5x32x1xf32, #tpu.memory_space<vmem>>, %arg6: memref<32x128xbf16, #tpu.memory_space<vmem>>) attributes {dimension_semantics = [#tpu.dimension_semantics<parallel>], iteration_bounds = array<i64: 1>, scalar_prefetch = 0 : i64, scratch_operands = 0 : i64, tpu.core_type = #tpu.core_type<tc>, window_params = [{transform_indices = @transform_0, window_bounds = array<i64: 144, 128>}, {pipeline_mode = #tpu.pipeline_mode<synchronous>, transform_indices = @transform_1, window_bounds = array<i64: 32, 144>}, {pipeline_mode = #tpu.pipeline_mode<synchronous>, transform_indices = @transform_2, window_bounds = array<i64: 32, 1>}, {pipeline_mode = #tpu.pipeline_mode<synchronous>, transform_indices = @transform_3, window_bounds = array<i64: 5, 32, 32>}, {pipeline_mode = #tpu.pipeline_mode<synchronous>, transform_indices = @transform_4, window_bounds = array<i64: 5, 32, 1>}, {transform_indices = @transform_5, window_bounds = array<i64: 32, 128>}]} {
    %c0 = arith.constant 0 : index
    %c0_0 = arith.constant 0 : index
    %0 = vector.load %arg2[%c0, %c0_0] : memref<32x144xf32, #tpu.memory_space<vmem>>, vector<32x144xf32>
    %c0_1 = arith.constant 0 : index
    %c0_2 = arith.constant 0 : index
    %1 = vector.load %arg1[%c0_1, %c0_2] : memref<144x128xbf16, #tpu.memory_space<vmem>>, vector<144x128xbf16>
    %2 = arith.extf %1 : vector<144x128xbf16> to vector<144x128xf32>
    %cst = arith.constant dense<0.000000e+00> : vector<32x128xf32>
    %3 = tpu.matmul %0, %2, %cst {dimension_numbers = #tpu.dot_dimension_numbers<[1], [0], [0], [1], [0, 0, 1, 1], [], []>} : vector<32x144xf32>, vector<144x128xf32>, vector<32x128xf32> -> vector<32x128xf32>
    %c0_3 = arith.constant 0 : index
    %c0_4 = arith.constant 0 : index
    %4 = vector.load %arg3[%c0_3, %c0_4] : memref<32x1xf32, #tpu.memory_space<vmem>>, vector<32x1xf32>
    %5 = vector.broadcast %4 : vector<32x1xf32> to vector<32x128xf32>
    %6 = arith.addf %3, %5 : vector<32x128xf32>
    %cst_5 = arith.constant 0.000000e+00 : f32
    %7 = vector.broadcast %cst_5 : f32 to vector<32x128xf32>
    %8 = arith.maximumf %6, %7 : vector<32x128xf32>
    %c0_6 = arith.constant 0 : index
    %c0_7 = arith.constant 0 : index
    %c0_8 = arith.constant 0 : index
    %9 = vector.load %arg4[%c0_6, %c0_7, %c0_8] : memref<5x32x32xf32, #tpu.memory_space<vmem>>, vector<1x32x32xf32>
    %10 = vector.shape_cast %9 : vector<1x32x32xf32> to vector<32x32xf32>
    %cst_9 = arith.constant dense<0.000000e+00> : vector<32x128xf32>
    %11 = tpu.matmul %10, %8, %cst_9 {dimension_numbers = #tpu.dot_dimension_numbers<[1], [0], [0], [1], [0, 0, 1, 1], [], []>} : vector<32x32xf32>, vector<32x128xf32>, vector<32x128xf32> -> vector<32x128xf32>
    %c0_10 = arith.constant 0 : index
    %c0_11 = arith.constant 0 : index
    %c0_12 = arith.constant 0 : index
    %12 = vector.load %arg5[%c0_10, %c0_11, %c0_12] : memref<5x32x1xf32, #tpu.memory_space<vmem>>, vector<1x32x1xf32>
    %13 = vector.shape_cast %12 : vector<1x32x1xf32> to vector<32x1xf32>
    %14 = vector.broadcast %13 : vector<32x1xf32> to vector<32x128xf32>
    %15 = arith.addf %11, %14 : vector<32x128xf32>
    %cst_13 = arith.constant 0.000000e+00 : f32
    %16 = vector.broadcast %cst_13 : f32 to vector<32x128xf32>
    %17 = arith.maximumf %15, %16 : vector<32x128xf32>
    %18 = arith.addf %8, %17 : vector<32x128xf32>
    %c1 = arith.constant 1 : index
    %c0_14 = arith.constant 0 : index
    %c0_15 = arith.constant 0 : index
    %19 = vector.load %arg4[%c1, %c0_14, %c0_15] : memref<5x32x32xf32, #tpu.memory_space<vmem>>, vector<1x32x32xf32>
    %20 = vector.shape_cast %19 : vector<1x32x32xf32> to vector<32x32xf32>
    %cst_16 = arith.constant dense<0.000000e+00> : vector<32x128xf32>
    %21 = tpu.matmul %20, %17, %cst_16 {dimension_numbers = #tpu.dot_dimension_numbers<[1], [0], [0], [1], [0, 0, 1, 1], [], []>} : vector<32x32xf32>, vector<32x128xf32>, vector<32x128xf32> -> vector<32x128xf32>
    %c1_17 = arith.constant 1 : index
    %c0_18 = arith.constant 0 : index
    %c0_19 = arith.constant 0 : index
    %22 = vector.load %arg5[%c1_17, %c0_18, %c0_19] : memref<5x32x1xf32, #tpu.memory_space<vmem>>, vector<1x32x1xf32>
    %23 = vector.shape_cast %22 : vector<1x32x1xf32> to vector<32x1xf32>
    %24 = vector.broadcast %23 : vector<32x1xf32> to vector<32x128xf32>
    %25 = arith.addf %21, %24 : vector<32x128xf32>
    %cst_20 = arith.constant 0.000000e+00 : f32
    %26 = vector.broadcast %cst_20 : f32 to vector<32x128xf32>
    %27 = arith.maximumf %25, %26 : vector<32x128xf32>
    %28 = arith.addf %18, %27 : vector<32x128xf32>
    %c2 = arith.constant 2 : index
    %c0_21 = arith.constant 0 : index
    %c0_22 = arith.constant 0 : index
    %29 = vector.load %arg4[%c2, %c0_21, %c0_22] : memref<5x32x32xf32, #tpu.memory_space<vmem>>, vector<1x32x32xf32>
    %30 = vector.shape_cast %29 : vector<1x32x32xf32> to vector<32x32xf32>
    %cst_23 = arith.constant dense<0.000000e+00> : vector<32x128xf32>
    %31 = tpu.matmul %30, %27, %cst_23 {dimension_numbers = #tpu.dot_dimension_numbers<[1], [0], [0], [1], [0, 0, 1, 1], [], []>} : vector<32x32xf32>, vector<32x128xf32>, vector<32x128xf32> -> vector<32x128xf32>
    %c2_24 = arith.constant 2 : index
    %c0_25 = arith.constant 0 : index
    %c0_26 = arith.constant 0 : index
    %32 = vector.load %arg5[%c2_24, %c0_25, %c0_26] : memref<5x32x1xf32, #tpu.memory_space<vmem>>, vector<1x32x1xf32>
    %33 = vector.shape_cast %32 : vector<1x32x1xf32> to vector<32x1xf32>
    %34 = vector.broadcast %33 : vector<32x1xf32> to vector<32x128xf32>
    %35 = arith.addf %31, %34 : vector<32x128xf32>
    %cst_27 = arith.constant 0.000000e+00 : f32
    %36 = vector.broadcast %cst_27 : f32 to vector<32x128xf32>
    %37 = arith.maximumf %35, %36 : vector<32x128xf32>
    %38 = arith.addf %28, %37 : vector<32x128xf32>
    %c3 = arith.constant 3 : index
    %c0_28 = arith.constant 0 : index
    %c0_29 = arith.constant 0 : index
    %39 = vector.load %arg4[%c3, %c0_28, %c0_29] : memref<5x32x32xf32, #tpu.memory_space<vmem>>, vector<1x32x32xf32>
    %40 = vector.shape_cast %39 : vector<1x32x32xf32> to vector<32x32xf32>
    %cst_30 = arith.constant dense<0.000000e+00> : vector<32x128xf32>
    %41 = tpu.matmul %40, %37, %cst_30 {dimension_numbers = #tpu.dot_dimension_numbers<[1], [0], [0], [1], [0, 0, 1, 1], [], []>} : vector<32x32xf32>, vector<32x128xf32>, vector<32x128xf32> -> vector<32x128xf32>
    %c3_31 = arith.constant 3 : index
    %c0_32 = arith.constant 0 : index
    %c0_33 = arith.constant 0 : index
    %42 = vector.load %arg5[%c3_31, %c0_32, %c0_33] : memref<5x32x1xf32, #tpu.memory_space<vmem>>, vector<1x32x1xf32>
    %43 = vector.shape_cast %42 : vector<1x32x1xf32> to vector<32x1xf32>
    %44 = vector.broadcast %43 : vector<32x1xf32> to vector<32x128xf32>
    %45 = arith.addf %41, %44 : vector<32x128xf32>
    %cst_34 = arith.constant 0.000000e+00 : f32
    %46 = vector.broadcast %cst_34 : f32 to vector<32x128xf32>
    %47 = arith.maximumf %45, %46 : vector<32x128xf32>
    %48 = arith.addf %38, %47 : vector<32x128xf32>
    %c4 = arith.constant 4 : index
    %c0_35 = arith.constant 0 : index
    %c0_36 = arith.constant 0 : index
    %49 = vector.load %arg4[%c4, %c0_35, %c0_36] : memref<5x32x32xf32, #tpu.memory_space<vmem>>, vector<1x32x32xf32>
    %50 = vector.shape_cast %49 : vector<1x32x32xf32> to vector<32x32xf32>
    %cst_37 = arith.constant dense<0.000000e+00> : vector<32x128xf32>
    %51 = tpu.matmul %50, %47, %cst_37 {dimension_numbers = #tpu.dot_dimension_numbers<[1], [0], [0], [1], [0, 0, 1, 1], [], []>} : vector<32x32xf32>, vector<32x128xf32>, vector<32x128xf32> -> vector<32x128xf32>
    %c4_38 = arith.constant 4 : index
    %c0_39 = arith.constant 0 : index
    %c0_40 = arith.constant 0 : index
    %52 = vector.load %arg5[%c4_38, %c0_39, %c0_40] : memref<5x32x1xf32, #tpu.memory_space<vmem>>, vector<1x32x1xf32>
    %53 = vector.shape_cast %52 : vector<1x32x1xf32> to vector<32x1xf32>
    %54 = vector.broadcast %53 : vector<32x1xf32> to vector<32x128xf32>
    %55 = arith.addf %51, %54 : vector<32x128xf32>
    %cst_41 = arith.constant 0.000000e+00 : f32
    %56 = vector.broadcast %cst_41 : f32 to vector<32x128xf32>
    %57 = arith.maximumf %55, %56 : vector<32x128xf32>
    %58 = arith.addf %48, %57 : vector<32x128xf32>
    %59 = arith.truncf %58 : vector<32x128xf32> to vector<32x128xbf16>
    %c0_42 = arith.constant 0 : index
    %c0_43 = arith.constant 0 : index
    %60 = vector.load %arg6[%c0_42, %c0_43] : memref<32x128xbf16, #tpu.memory_space<vmem>>, vector<32x128xbf16>
    tpu.vector_store %arg6[%c0_42, %c0_43], %59 {strides = array<i32>} : memref<32x128xbf16, #tpu.memory_space<vmem>>, vector<32x128xbf16>,
    return
  }
  func.func @transform_0(%arg0: i32) -> (i32, i32) {
    %c0_i32 = arith.constant 0 : i32
    %c0_i32_0 = arith.constant 0 : i32
    return %c0_i32, %arg0 : i32, i32
  }
  func.func @transform_1(%arg0: i32) -> (i32, i32) {
    %c0_i32 = arith.constant 0 : i32
    %c0_i32_0 = arith.constant 0 : i32
    %c0_i32_1 = arith.constant 0 : i32
    return %c0_i32, %c0_i32_0 : i32, i32
  }
  func.func @transform_2(%arg0: i32) -> (i32, i32) {
    %c0_i32 = arith.constant 0 : i32
    %c0_i32_0 = arith.constant 0 : i32
    %c0_i32_1 = arith.constant 0 : i32
    return %c0_i32, %c0_i32_0 : i32, i32
  }
  func.func @transform_3(%arg0: i32) -> (i32, i32, i32) {
    %c0_i32 = arith.constant 0 : i32
    %c0_i32_0 = arith.constant 0 : i32
    %c0_i32_1 = arith.constant 0 : i32
    %c0_i32_2 = arith.constant 0 : i32
    return %c0_i32, %c0_i32_0, %c0_i32_1 : i32, i32, i32
  }
  func.func @transform_4(%arg0: i32) -> (i32, i32, i32) {
    %c0_i32 = arith.constant 0 : i32
    %c0_i32_0 = arith.constant 0 : i32
    %c0_i32_1 = arith.constant 0 : i32
    %c0_i32_2 = arith.constant 0 : i32
    return %c0_i32, %c0_i32_0, %c0_i32_1 : i32, i32, i32
  }
  func.func @transform_5(%arg0: i32) -> (i32, i32) {
    %c0_i32 = arith.constant 0 : i32
    %c0_i32_0 = arith.constant 0 : i32
    return %c0_i32, %arg0 : i32, i32
  }
}

module attributes {stable_mosaic.version = 11 : i64} {
  func.func @_convt_skip_kernel(%arg0: i32, %arg1: memref<128x128xbf16, #tpu.memory_space<vmem>>, %arg2: memref<64x128xbf16, #tpu.memory_space<vmem>>, %arg3: memref<64x128xbf16, #tpu.memory_space<vmem>>, %arg4: memref<64x128xf32, #tpu.memory_space<vmem>>, %arg5: memref<64x1xf32, #tpu.memory_space<vmem>>, %arg6: memref<64x128xbf16, #tpu.memory_space<vmem>>) attributes {dimension_semantics = [#tpu.dimension_semantics<parallel>], iteration_bounds = array<i64: 1>, scalar_prefetch = 0 : i64, scratch_operands = 0 : i64, tpu.core_type = #tpu.core_type<tc>, window_params = [{transform_indices = @transform_0, window_bounds = array<i64: 128, 128>}, {transform_indices = @transform_1, window_bounds = array<i64: 64, 128>}, {transform_indices = @transform_2, window_bounds = array<i64: 64, 128>}, {pipeline_mode = #tpu.pipeline_mode<synchronous>, transform_indices = @transform_3, window_bounds = array<i64: 64, 128>}, {pipeline_mode = #tpu.pipeline_mode<synchronous>, transform_indices = @transform_4, window_bounds = array<i64: 64, 1>}, {transform_indices = @transform_5, window_bounds = array<i64: 64, 128>}]} {
    %c0 = arith.constant 0 : index
    %c0_0 = arith.constant 0 : index
    %0 = vector.load %arg4[%c0, %c0_0] : memref<64x128xf32, #tpu.memory_space<vmem>>, vector<64x128xf32>
    %c0_1 = arith.constant 0 : index
    %c0_2 = arith.constant 0 : index
    %1 = vector.load %arg1[%c0_1, %c0_2] : memref<128x128xbf16, #tpu.memory_space<vmem>>, vector<128x128xbf16>
    %2 = arith.extf %1 : vector<128x128xbf16> to vector<128x128xf32>
    %cst = arith.constant dense<0.000000e+00> : vector<64x128xf32>
    %3 = tpu.matmul %0, %2, %cst {dimension_numbers = #tpu.dot_dimension_numbers<[1], [0], [0], [1], [0, 0, 1, 1], [], []>} : vector<64x128xf32>, vector<128x128xf32>, vector<64x128xf32> -> vector<64x128xf32>
    %c0_3 = arith.constant 0 : index
    %c0_4 = arith.constant 0 : index
    %4 = vector.load %arg5[%c0_3, %c0_4] : memref<64x1xf32, #tpu.memory_space<vmem>>, vector<64x1xf32>
    %5 = vector.broadcast %4 : vector<64x1xf32> to vector<64x128xf32>
    %6 = arith.addf %3, %5 : vector<64x128xf32>
    %cst_5 = arith.constant 0.000000e+00 : f32
    %7 = vector.broadcast %cst_5 : f32 to vector<64x128xf32>
    %8 = arith.maximumf %6, %7 : vector<64x128xf32>
    %c0_6 = arith.constant 0 : index
    %c0_7 = arith.constant 0 : index
    %9 = vector.load %arg2[%c0_6, %c0_7] : memref<64x128xbf16, #tpu.memory_space<vmem>>, vector<64x128xbf16>
    %10 = arith.extf %9 : vector<64x128xbf16> to vector<64x128xf32>
    %11 = arith.mulf %8, %10 : vector<64x128xf32>
    %c0_8 = arith.constant 0 : index
    %c0_9 = arith.constant 0 : index
    %12 = vector.load %arg3[%c0_8, %c0_9] : memref<64x128xbf16, #tpu.memory_space<vmem>>, vector<64x128xbf16>
    %13 = arith.extf %12 : vector<64x128xbf16> to vector<64x128xf32>
    %14 = arith.addf %11, %13 : vector<64x128xf32>
    %15 = arith.truncf %14 : vector<64x128xf32> to vector<64x128xbf16>
    %c0_10 = arith.constant 0 : index
    %c0_11 = arith.constant 0 : index
    %16 = vector.load %arg6[%c0_10, %c0_11] : memref<64x128xbf16, #tpu.memory_space<vmem>>, vector<64x128xbf16>
    tpu.vector_store %arg6[%c0_10, %c0_11], %15 {strides = array<i32>} : memref<64x128xbf16, #tpu.memory_space<vmem>>, vector<64x128xbf16>,
    return
  }
  func.func @transform_0(%arg0: i32) -> (i32, i32) {
    %c0_i32 = arith.constant 0 : i32
    %c0_i32_0 = arith.constant 0 : i32
    return %c0_i32, %arg0 : i32, i32
  }
  func.func @transform_1(%arg0: i32) -> (i32, i32) {
    %c0_i32 = arith.constant 0 : i32
    %c0_i32_0 = arith.constant 0 : i32
    return %c0_i32, %arg0 : i32, i32
  }
  func.func @transform_2(%arg0: i32) -> (i32, i32) {
    %c0_i32 = arith.constant 0 : i32
    %c0_i32_0 = arith.constant 0 : i32
    return %c0_i32, %arg0 : i32, i32
  }
  func.func @transform_3(%arg0: i32) -> (i32, i32) {
    %c0_i32 = arith.constant 0 : i32
    %c0_i32_0 = arith.constant 0 : i32
    %c0_i32_1 = arith.constant 0 : i32
    return %c0_i32, %c0_i32_0 : i32, i32
  }
  func.func @transform_4(%arg0: i32) -> (i32, i32) {
    %c0_i32 = arith.constant 0 : i32
    %c0_i32_0 = arith.constant 0 : i32
    %c0_i32_1 = arith.constant 0 : i32
    return %c0_i32, %c0_i32_0 : i32, i32
  }
  func.func @transform_5(%arg0: i32) -> (i32, i32) {
    %c0_i32 = arith.constant 0 : i32
    %c0_i32_0 = arith.constant 0 : i32
    return %c0_i32, %arg0 : i32, i32
  }
}

module attributes {stable_mosaic.version = 11 : i64} {
  func.func @_convt_skip_kernel(%arg0: i32, %arg1: memref<64x128xbf16, #tpu.memory_space<vmem>>, %arg2: memref<32x128xbf16, #tpu.memory_space<vmem>>, %arg3: memref<32x128xbf16, #tpu.memory_space<vmem>>, %arg4: memref<32x64xf32, #tpu.memory_space<vmem>>, %arg5: memref<32x1xf32, #tpu.memory_space<vmem>>, %arg6: memref<32x128xbf16, #tpu.memory_space<vmem>>) attributes {dimension_semantics = [#tpu.dimension_semantics<parallel>], iteration_bounds = array<i64: 1>, scalar_prefetch = 0 : i64, scratch_operands = 0 : i64, tpu.core_type = #tpu.core_type<tc>, window_params = [{transform_indices = @transform_0, window_bounds = array<i64: 64, 128>}, {transform_indices = @transform_1, window_bounds = array<i64: 32, 128>}, {transform_indices = @transform_2, window_bounds = array<i64: 32, 128>}, {pipeline_mode = #tpu.pipeline_mode<synchronous>, transform_indices = @transform_3, window_bounds = array<i64: 32, 64>}, {pipeline_mode = #tpu.pipeline_mode<synchronous>, transform_indices = @transform_4, window_bounds = array<i64: 32, 1>}, {transform_indices = @transform_5, window_bounds = array<i64: 32, 128>}]} {
    %c0 = arith.constant 0 : index
    %c0_0 = arith.constant 0 : index
    %0 = vector.load %arg4[%c0, %c0_0] : memref<32x64xf32, #tpu.memory_space<vmem>>, vector<32x64xf32>
    %c0_1 = arith.constant 0 : index
    %c0_2 = arith.constant 0 : index
    %1 = vector.load %arg1[%c0_1, %c0_2] : memref<64x128xbf16, #tpu.memory_space<vmem>>, vector<64x128xbf16>
    %2 = arith.extf %1 : vector<64x128xbf16> to vector<64x128xf32>
    %cst = arith.constant dense<0.000000e+00> : vector<32x128xf32>
    %3 = tpu.matmul %0, %2, %cst {dimension_numbers = #tpu.dot_dimension_numbers<[1], [0], [0], [1], [0, 0, 1, 1], [], []>} : vector<32x64xf32>, vector<64x128xf32>, vector<32x128xf32> -> vector<32x128xf32>
    %c0_3 = arith.constant 0 : index
    %c0_4 = arith.constant 0 : index
    %4 = vector.load %arg5[%c0_3, %c0_4] : memref<32x1xf32, #tpu.memory_space<vmem>>, vector<32x1xf32>
    %5 = vector.broadcast %4 : vector<32x1xf32> to vector<32x128xf32>
    %6 = arith.addf %3, %5 : vector<32x128xf32>
    %cst_5 = arith.constant 0.000000e+00 : f32
    %7 = vector.broadcast %cst_5 : f32 to vector<32x128xf32>
    %8 = arith.maximumf %6, %7 : vector<32x128xf32>
    %c0_6 = arith.constant 0 : index
    %c0_7 = arith.constant 0 : index
    %9 = vector.load %arg2[%c0_6, %c0_7] : memref<32x128xbf16, #tpu.memory_space<vmem>>, vector<32x128xbf16>
    %10 = arith.extf %9 : vector<32x128xbf16> to vector<32x128xf32>
    %11 = arith.mulf %8, %10 : vector<32x128xf32>
    %c0_8 = arith.constant 0 : index
    %c0_9 = arith.constant 0 : index
    %12 = vector.load %arg3[%c0_8, %c0_9] : memref<32x128xbf16, #tpu.memory_space<vmem>>, vector<32x128xbf16>
    %13 = arith.extf %12 : vector<32x128xbf16> to vector<32x128xf32>
    %14 = arith.addf %11, %13 : vector<32x128xf32>
    %15 = arith.truncf %14 : vector<32x128xf32> to vector<32x128xbf16>
    %c0_10 = arith.constant 0 : index
    %c0_11 = arith.constant 0 : index
    %16 = vector.load %arg6[%c0_10, %c0_11] : memref<32x128xbf16, #tpu.memory_space<vmem>>, vector<32x128xbf16>
    tpu.vector_store %arg6[%c0_10, %c0_11], %15 {strides = array<i32>} : memref<32x128xbf16, #tpu.memory_space<vmem>>, vector<32x128xbf16>,
    return
  }
  func.func @transform_0(%arg0: i32) -> (i32, i32) {
    %c0_i32 = arith.constant 0 : i32
    %c0_i32_0 = arith.constant 0 : i32
    return %c0_i32, %arg0 : i32, i32
  }
  func.func @transform_1(%arg0: i32) -> (i32, i32) {
    %c0_i32 = arith.constant 0 : i32
    %c0_i32_0 = arith.constant 0 : i32
    return %c0_i32, %arg0 : i32, i32
  }
  func.func @transform_2(%arg0: i32) -> (i32, i32) {
    %c0_i32 = arith.constant 0 : i32
    %c0_i32_0 = arith.constant 0 : i32
    return %c0_i32, %arg0 : i32, i32
  }
  func.func @transform_3(%arg0: i32) -> (i32, i32) {
    %c0_i32 = arith.constant 0 : i32
    %c0_i32_0 = arith.constant 0 : i32
    %c0_i32_1 = arith.constant 0 : i32
    return %c0_i32, %c0_i32_0 : i32, i32
  }
  func.func @transform_4(%arg0: i32) -> (i32, i32) {
    %c0_i32 = arith.constant 0 : i32
    %c0_i32_0 = arith.constant 0 : i32
    %c0_i32_1 = arith.constant 0 : i32
    return %c0_i32, %c0_i32_0 : i32, i32
  }
  func.func @transform_5(%arg0: i32) -> (i32, i32) {
    %c0_i32 = arith.constant 0 : i32
    %c0_i32_0 = arith.constant 0 : i32
    return %c0_i32, %arg0 : i32, i32
  }
}

module attributes {stable_mosaic.version = 11 : i64} {
  func.func @_convt_skip_kernel(%arg0: i32, %arg1: memref<32x128xbf16, #tpu.memory_space<vmem>>, %arg2: memref<16x128xbf16, #tpu.memory_space<vmem>>, %arg3: memref<16x128xbf16, #tpu.memory_space<vmem>>, %arg4: memref<16x32xf32, #tpu.memory_space<vmem>>, %arg5: memref<16x1xf32, #tpu.memory_space<vmem>>, %arg6: memref<16x128xbf16, #tpu.memory_space<vmem>>) attributes {dimension_semantics = [#tpu.dimension_semantics<parallel>], iteration_bounds = array<i64: 1>, scalar_prefetch = 0 : i64, scratch_operands = 0 : i64, tpu.core_type = #tpu.core_type<tc>, window_params = [{transform_indices = @transform_0, window_bounds = array<i64: 32, 128>}, {transform_indices = @transform_1, window_bounds = array<i64: 16, 128>}, {transform_indices = @transform_2, window_bounds = array<i64: 16, 128>}, {pipeline_mode = #tpu.pipeline_mode<synchronous>, transform_indices = @transform_3, window_bounds = array<i64: 16, 32>}, {pipeline_mode = #tpu.pipeline_mode<synchronous>, transform_indices = @transform_4, window_bounds = array<i64: 16, 1>}, {transform_indices = @transform_5, window_bounds = array<i64: 16, 128>}]} {
    %c0 = arith.constant 0 : index
    %c0_0 = arith.constant 0 : index
    %0 = vector.load %arg4[%c0, %c0_0] : memref<16x32xf32, #tpu.memory_space<vmem>>, vector<16x32xf32>
    %c0_1 = arith.constant 0 : index
    %c0_2 = arith.constant 0 : index
    %1 = vector.load %arg1[%c0_1, %c0_2] : memref<32x128xbf16, #tpu.memory_space<vmem>>, vector<32x128xbf16>
    %2 = arith.extf %1 : vector<32x128xbf16> to vector<32x128xf32>
    %cst = arith.constant dense<0.000000e+00> : vector<16x128xf32>
    %3 = tpu.matmul %0, %2, %cst {dimension_numbers = #tpu.dot_dimension_numbers<[1], [0], [0], [1], [0, 0, 1, 1], [], []>} : vector<16x32xf32>, vector<32x128xf32>, vector<16x128xf32> -> vector<16x128xf32>
    %c0_3 = arith.constant 0 : index
    %c0_4 = arith.constant 0 : index
    %4 = vector.load %arg5[%c0_3, %c0_4] : memref<16x1xf32, #tpu.memory_space<vmem>>, vector<16x1xf32>
    %5 = vector.broadcast %4 : vector<16x1xf32> to vector<16x128xf32>
    %6 = arith.addf %3, %5 : vector<16x128xf32>
    %cst_5 = arith.constant 0.000000e+00 : f32
    %7 = vector.broadcast %cst_5 : f32 to vector<16x128xf32>
    %8 = arith.maximumf %6, %7 : vector<16x128xf32>
    %c0_6 = arith.constant 0 : index
    %c0_7 = arith.constant 0 : index
    %9 = vector.load %arg2[%c0_6, %c0_7] : memref<16x128xbf16, #tpu.memory_space<vmem>>, vector<16x128xbf16>
    %10 = arith.extf %9 : vector<16x128xbf16> to vector<16x128xf32>
    %11 = arith.mulf %8, %10 : vector<16x128xf32>
    %c0_8 = arith.constant 0 : index
    %c0_9 = arith.constant 0 : index
    %12 = vector.load %arg3[%c0_8, %c0_9] : memref<16x128xbf16, #tpu.memory_space<vmem>>, vector<16x128xbf16>
    %13 = arith.extf %12 : vector<16x128xbf16> to vector<16x128xf32>
    %14 = arith.addf %11, %13 : vector<16x128xf32>
    %15 = arith.truncf %14 : vector<16x128xf32> to vector<16x128xbf16>
    %c0_10 = arith.constant 0 : index
    %c0_11 = arith.constant 0 : index
    %16 = vector.load %arg6[%c0_10, %c0_11] : memref<16x128xbf16, #tpu.memory_space<vmem>>, vector<16x128xbf16>
    tpu.vector_store %arg6[%c0_10, %c0_11], %15 {strides = array<i32>} : memref<16x128xbf16, #tpu.memory_space<vmem>>, vector<16x128xbf16>,
    return
  }
  func.func @transform_0(%arg0: i32) -> (i32, i32) {
    %c0_i32 = arith.constant 0 : i32
    %c0_i32_0 = arith.constant 0 : i32
    return %c0_i32, %arg0 : i32, i32
  }
  func.func @transform_1(%arg0: i32) -> (i32, i32) {
    %c0_i32 = arith.constant 0 : i32
    %c0_i32_0 = arith.constant 0 : i32
    return %c0_i32, %arg0 : i32, i32
  }
  func.func @transform_2(%arg0: i32) -> (i32, i32) {
    %c0_i32 = arith.constant 0 : i32
    %c0_i32_0 = arith.constant 0 : i32
    return %c0_i32, %arg0 : i32, i32
  }
  func.func @transform_3(%arg0: i32) -> (i32, i32) {
    %c0_i32 = arith.constant 0 : i32
    %c0_i32_0 = arith.constant 0 : i32
    %c0_i32_1 = arith.constant 0 : i32
    return %c0_i32, %c0_i32_0 : i32, i32
  }
  func.func @transform_4(%arg0: i32) -> (i32, i32) {
    %c0_i32 = arith.constant 0 : i32
    %c0_i32_0 = arith.constant 0 : i32
    %c0_i32_1 = arith.constant 0 : i32
    return %c0_i32, %c0_i32_0 : i32, i32
  }
  func.func @transform_5(%arg0: i32) -> (i32, i32) {
    %c0_i32 = arith.constant 0 : i32
    %c0_i32_0 = arith.constant 0 : i32
    return %c0_i32, %arg0 : i32, i32
  }
}

module attributes {stable_mosaic.version = 11 : i64} {
  func.func @_conv_final_kernel(%arg0: i32, %arg1: memref<36x256xbf16, #tpu.memory_space<vmem>>, %arg2: memref<4x36xf32, #tpu.memory_space<vmem>>, %arg3: memref<4x1xf32, #tpu.memory_space<vmem>>, %arg4: memref<2x4xf32, #tpu.memory_space<vmem>>, %arg5: memref<2x1xf32, #tpu.memory_space<vmem>>, %arg6: memref<2x256xf32, #tpu.memory_space<vmem>>) attributes {dimension_semantics = [#tpu.dimension_semantics<parallel>], iteration_bounds = array<i64: 2>, scalar_prefetch = 0 : i64, scratch_operands = 0 : i64, tpu.core_type = #tpu.core_type<tc>, window_params = [{transform_indices = @transform_0, window_bounds = array<i64: 36, 256>}, {pipeline_mode = #tpu.pipeline_mode<synchronous>, transform_indices = @transform_1, window_bounds = array<i64: 4, 36>}, {pipeline_mode = #tpu.pipeline_mode<synchronous>, transform_indices = @transform_2, window_bounds = array<i64: 4, 1>}, {pipeline_mode = #tpu.pipeline_mode<synchronous>, transform_indices = @transform_3, window_bounds = array<i64: 2, 4>}, {pipeline_mode = #tpu.pipeline_mode<synchronous>, transform_indices = @transform_4, window_bounds = array<i64: 2, 1>}, {transform_indices = @transform_5, window_bounds = array<i64: 2, 256>}]} {
    %c0 = arith.constant 0 : index
    %c0_0 = arith.constant 0 : index
    %0 = vector.load %arg2[%c0, %c0_0] : memref<4x36xf32, #tpu.memory_space<vmem>>, vector<4x36xf32>
    %c0_1 = arith.constant 0 : index
    %c0_2 = arith.constant 0 : index
    %1 = vector.load %arg1[%c0_1, %c0_2] : memref<36x256xbf16, #tpu.memory_space<vmem>>, vector<36x256xbf16>
    %2 = arith.extf %1 : vector<36x256xbf16> to vector<36x256xf32>
    %cst = arith.constant dense<0.000000e+00> : vector<4x256xf32>
    %3 = tpu.matmul %0, %2, %cst {dimension_numbers = #tpu.dot_dimension_numbers<[1], [0], [0], [1], [0, 0, 1, 1], [], []>} : vector<4x36xf32>, vector<36x256xf32>, vector<4x256xf32> -> vector<4x256xf32>
    %c0_3 = arith.constant 0 : index
    %c0_4 = arith.constant 0 : index
    %4 = vector.load %arg3[%c0_3, %c0_4] : memref<4x1xf32, #tpu.memory_space<vmem>>, vector<4x1xf32>
    %5 = vector.broadcast %4 : vector<4x1xf32> to vector<4x256xf32>
    %6 = arith.addf %3, %5 : vector<4x256xf32>
    %cst_5 = arith.constant 0.000000e+00 : f32
    %7 = vector.broadcast %cst_5 : f32 to vector<4x256xf32>
    %8 = arith.maximumf %6, %7 : vector<4x256xf32>
    %c0_6 = arith.constant 0 : index
    %c0_7 = arith.constant 0 : index
    %9 = vector.load %arg4[%c0_6, %c0_7] : memref<2x4xf32, #tpu.memory_space<vmem>>, vector<2x4xf32>
    %cst_8 = arith.constant dense<0.000000e+00> : vector<2x256xf32>
    %10 = tpu.matmul %9, %8, %cst_8 {dimension_numbers = #tpu.dot_dimension_numbers<[1], [0], [0], [1], [0, 0, 1, 1], [], []>} : vector<2x4xf32>, vector<4x256xf32>, vector<2x256xf32> -> vector<2x256xf32>
    %c0_9 = arith.constant 0 : index
    %c0_10 = arith.constant 0 : index
    %11 = vector.load %arg5[%c0_9, %c0_10] : memref<2x1xf32, #tpu.memory_space<vmem>>, vector<2x1xf32>
    %12 = vector.broadcast %11 : vector<2x1xf32> to vector<2x256xf32>
    %13 = arith.addf %10, %12 : vector<2x256xf32>
    %c0_11 = arith.constant 0 : index
    %c0_12 = arith.constant 0 : index
    %14 = vector.load %arg6[%c0_11, %c0_12] : memref<2x256xf32, #tpu.memory_space<vmem>>, vector<2x256xf32>
    tpu.vector_store %arg6[%c0_11, %c0_12], %13 {strides = array<i32>} : memref<2x256xf32, #tpu.memory_space<vmem>>, vector<2x256xf32>,
    return
  }
  func.func @transform_0(%arg0: i32) -> (i32, i32) {
    %c0_i32 = arith.constant 0 : i32
    %c0_i32_0 = arith.constant 0 : i32
    return %c0_i32, %arg0 : i32, i32
  }
  func.func @transform_1(%arg0: i32) -> (i32, i32) {
    %c0_i32 = arith.constant 0 : i32
    %c0_i32_0 = arith.constant 0 : i32
    %c0_i32_1 = arith.constant 0 : i32
    return %c0_i32, %c0_i32_0 : i32, i32
  }
  func.func @transform_2(%arg0: i32) -> (i32, i32) {
    %c0_i32 = arith.constant 0 : i32
    %c0_i32_0 = arith.constant 0 : i32
    %c0_i32_1 = arith.constant 0 : i32
    return %c0_i32, %c0_i32_0 : i32, i32
  }
  func.func @transform_3(%arg0: i32) -> (i32, i32) {
    %c0_i32 = arith.constant 0 : i32
    %c0_i32_0 = arith.constant 0 : i32
    %c0_i32_1 = arith.constant 0 : i32
    return %c0_i32, %c0_i32_0 : i32, i32
  }
  func.func @transform_4(%arg0: i32) -> (i32, i32) {
    %c0_i32 = arith.constant 0 : i32
    %c0_i32_0 = arith.constant 0 : i32
    %c0_i32_1 = arith.constant 0 : i32
    return %c0_i32, %c0_i32_0 : i32, i32
  }
  func.func @transform_5(%arg0: i32) -> (i32, i32) {
    %c0_i32 = arith.constant 0 : i32
    %c0_i32_0 = arith.constant 0 : i32
    return %c0_i32, %arg0 : i32, i32
  }
}

</mosaic_0001>

<bundles_post_ra>
// kernel: unet_tiny_sum_forward.13
= control target key start
LH: loop header
LB: loop body
LE: loop exit
PB: predicated region body
PF: predicated region fallthrough
CT: control target
= control target key end

     0   :  { %s516_s12 = smov 0   ;;  %s518_s13 = smov 0   ;;  %s574_s0 = inlined_call_operand.vmem [shape: bf16[36,512], index: 0, kind: input, shape index: {}]   ;;  %s575_s1 = inlined_call_operand.vmem [shape: f32[4,36], index: 1, kind: input, shape index: {}]   ;;  %s576_s2 = inlined_call_operand.vmem [shape: f32[4,1], index: 2, kind: input, shape index: {}]   ;;  %s577_s3 = inlined_call_operand.vmem [shape: bf16[4,512], index: 3, kind: output, shape index: {}]  }
   0x1   :  { %s520_s14 = smov 0  }
   0x2 LB: > { %s406_s15 = sadd.s32 4294967295, %s492_s14   ;;  %s533_s16 = sadd.s32 1, %s492_s14   ;;  %s492_s14 = sphi %s520_s14, %s580_s14   ;;  %s488_s13 = sphi %s518_s13, %s579_s13   ;;  %s484_s12 = sphi %s516_s12, %s578_s12  }
   0x3   : > { %s17_s17 = ssub.s32 %s492_s14, %s533_s16  ;;  %s20_s18 = sadd.s32 1, %s488_s13 }
   0x4   : > { %p18_p0 = scmp.eq.s32.totalorder %s17_s17, 0  ;;  %p27_p1 = scmp.ne.s32.totalorder %s488_s13, %s484_s12 }
   0x5   : > { %p28_p2 = scmp.eq.s32.totalorder %s492_s14, 0  ;;  %p409_p4 = scmp.ge.s32.totalorder %s492_s14, 2 }
   0x6   : > { %s542_s19 = scalar_select %p18_p0, %s488_s13, %s20_s18  }
   0x7   : > { %p29_p3 = por %p28_p2, %p27_p1  ;;  %127 = sbr.rel (%p409_p4) target bundleno = 21 (0x15), region = 24 }
   0xe   : > { %130 = sbr.rel (!%p29_p3) target bundleno = 21 (0x15), region = 28  ;;  %s132_s20 = sand.u32 (%p29_p3), 1, %s488_s13  }
   0xf   : > { %s422_s21 = sshll.u32 (%p29_p3), %s492_s14, 3  ;;  %s435_s22 = smul.u32 (%p29_p3), 40, %s132_s20 }
  0x10   : > { %s137_s25 = scalar_lea.vmem (%p29_p3), %s574_s0, %s422_s21 }
  0x11   : > { %v173_v0 = vld [vmem:[%s137_s25] sm:$0xff] (%p29_p3)  ;;  %v175_v1 = vld [vmem:[%s137_s25 + $0x10] sm:$0xff] (%p29_p3)  ;;  %s134_s26 = scalar_lea.vmem (%p29_p3), [#allocation2], %s435_s22 }
  0x12   : > { %v177_v2 = vld [vmem:[%s137_s25 + $0x20] sm:$0xff] (%p29_p3)  ;;  %v179_v3 = vld [vmem:[%s137_s25 + $0x30] sm:$0xff] (%p29_p3)  ;;  %174 = vst [vmem:[%s134_s26] sm:$0xff] (%p29_p3), %v173_v0  ;;  %176 = vst [vmem:[%s134_s26 + $0x8] sm:$0xff] (%p29_p3), %v175_v1 }
  0x13   : > { %v181_v4 = vld [vmem:[%s137_s25 + $0x40] sm:$0xff] (%p29_p3)  ;;  %178 = vst [vmem:[%s134_s26 + $0x10] sm:$0xff] (%p29_p3), %v177_v2  ;;  %180 = vst [vmem:[%s134_s26 + $0x18] sm:$0xff] (%p29_p3), %v179_v3 }
  0x14   : > { %182 = vst [vmem:[%s134_s26 + $0x20] sm:$0xff] (%p29_p3), %v181_v4 }
  0x15 PF: > { %p412_p5 = scmp.ge.s32.totalorder %s492_s14, 1  ;;  %p187_p6 = scmp.lt.s32.totalorder %s492_s14, 3 }
  0x17   : > { %p188_p7 = pnand %p412_p5, %p187_p6 }
  0x18   : > { %s194_s27 = sand.u32 (!%p188_p7), 1, %s484_s12   ;;  %v494_v5 = vmov (!%p188_p7), 0.0   ;;  %v240_v6 = vld [vmem:[%s576_s2] sm:$0xf] (!%p188_p7)  ;;  %v495_v7 = vmov (!%p188_p7), 0   ;;  %vm250_vm0 = vcmask (!%p188_p7), 1043456  }
  0x19   : > { %191 = sbr.rel (%p188_p7) target bundleno = 260 (0x104), region = 66  ;;  %321 = vmatprep.mubr.f32.mxu0 (!%p188_p7), %v494_v5  ;;  %463 = vset.pattern.permute.xlu0 (!%p188_p7), %v495_v7  ;;  %v224_v15 = vld [vmem:[%s575_s1] sm:$0xf] (!%p188_p7)  ;;  %vm246_vm1 = vcmask (!%p188_p7), 293888   ;;  %s413_s7 = sshll.u32 (!%p188_p7), %s406_s15, 1 }
  0x1a   : > { %s436_s28 = smul.u32 (!%p188_p7), 40, %s194_s27  ;;  %243 = vperm.xlu0 (!%p188_p7), %463, %v240_v6   ;;  %p219_p8 = scmp.lt.s32.totalorder (!%p188_p7), %s413_s7, 3 }
  0x1c   : > { %s196_s4 = scalar_lea.vmem (!%p188_p7), [#allocation2], %s436_s28 }
  0x1d   : > { %v464_v8 = vld [vmem:[%s196_s4 + $0x4] ss:$8 sps:$4 sm:$0xff] (!%p188_p7)   ;;  %v466_v9 = vld [vmem:[%s196_s4] ss:$8 sps:$4 sm:$0xff] (!%p188_p7)   ;;  %v467_v10 = vld [vmem:[%s196_s4 + $0x14] ss:$8 sps:$4 sm:$0xff] (!%p188_p7)  }
  0x1e   : > { %424 = vmatprep.subr.bf16.mxu0 (!%p188_p7), %v464_v8  ;;  %v229_v11 = vld [vmem:[%s196_s4 + $0x20] sm:$0x33] (!%p188_p7)  ;;  %v469_v12 = vld [vmem:[%s196_s4 + $0x10] ss:$8 sps:$4 sm:$0xff] (!%p188_p7)  }
  0x1f   : > { %426 = vmatpush1.bf16.msra.mxu0 (!%p188_p7), %v466_v9  ;;  %v239_v13 = vunpack.c.h.bf16 (!%p188_p7), %v229_v11  ;;  %v238_v14 = vunpack.c.l.bf16 (!%p188_p7), %v229_v11 }
  0x20   : > { %428 = vmatprep.subr.bf16.mxu0 %v467_v10  ;;  %s582_s7 = smov (!%p219_p8, %s413_s7), 3 }
  0x21   : > { %s414_s8 = sshll.u32 %s582_s7, 1 }
  0x22   : > { %s222_s11 = scalar_lea.vmem %s577_s3, %s414_s8 }
  0x23   : > { %430 = vmatpush1.bf16.msra.mxu0 %v469_v12 }
  0x24   : > { %415 = vmatprep.subr.msk.mxu0 %vm250_vm0, %v239_v13 }
  0x27   : > { %416 = vmatpush1.msk.msra.mxu0 %vm250_vm0, %v238_v14 }
  0x28   : > { %417 = vmatmul.mubr.msk.f32.vlgmr.msra.gmra.mrb[0].mxu0 %vm246_vm1, %v224_v15 }
  0x99   : > { %v244_v16 = vpop.permute.xlu0 %243 }
  0xfb   : > { %v323_v17 = vpop.f32.mrb[0].mxu0 }
  0xfc   : > { %v324_v18 = vadd.f32 %v323_v17, %v244_v16  ;;  %v325_v19 = vpop.f32.mrb[1].mxu0 }
  0xfd   : > { %v326_v20 = vadd.f32 %v325_v19, %v244_v16 }
  0xfe   : > { %v328_v21 = vmax.f32 %v324_v18, 0.0 }
  0xff   : > { %v329_v22 = vmax.f32 %v326_v20, 0.0 }
 0x101   : > { %v418_v23 = vpack.c.bf16 %v329_v22, %v328_v21 }
 0x103   : > { %419 = vst.sshfl [vmem:[%s222_s11] sm:$0x33 pattern:$0x76325410] %v418_v23 }
 0x104 PF: > { %p10_p9 = scmp.ge.s32.totalorder %s533_s16, 4   ;;  %s578_s12 = smov %s488_s13 }
 0x105   : > { %s579_s13 = smov %s542_s19  ;;  %s580_s14 = smov %s533_s16 }
 0x106   :  { %12 = sbr.rel (!%p10_p9) target bundleno = 2 (0x2), region = 105 }

// kernel: unet_tiny_sum_forward.14
= control target key start
LH: loop header
LB: loop body
LE: loop exit
PB: predicated region body
PF: predicated region fallthrough
CT: control target
= control target key end

     0   :  { %v157_v0 = vmov 0.0|0.0   ;;  %vm158_vm0 = vmmov 0   ;;  %v159_v2 = vmov 0.0   ;;  %v160_v3 = vmov 0   ;;  %s199_s0 = inlined_call_operand.vmem [shape: bf16[36,128], index: 0, kind: input, shape index: {}]   ;;  %s200_s2 = inlined_call_operand.vmem [shape: f32[4,1], index: 2, kind: input, shape index: {}]   ;;  %s201_s1 = inlined_call_operand.vmem [shape: f32[4,36], index: 1, kind: input, shape index: {}]   ;;  %s202_s3 = inlined_call_operand.vmem [shape: bf16[4,128], index: 3, kind: output, shape index: {}]  }
   0x1   :  { %146 = vmatprep.subr.bf16.mxu0 %v157_v0  ;;  %v119_v1 = vld [vmem:[%s199_s0] sm:$0xff]   ;;  %143 = vmatprep.mubr.msk.f32.mxu0 %vm158_vm0, %v159_v2  ;;  %v19_v5 = vld [vmem:[%s199_s0 + $0x10] sm:$0x3]  ;;  %v126_v6 = vld [vmem:[%s199_s0 + $0x8] sm:$0xff]   ;;  %vm35_vm1 = vcmask 1043456   ;;  %vm31_vm2 = vcmask 293888  }
   0x2   :  { %148 = vmatpush3.bf16.msra.mxu0 %v119_v1  ;;  %156 = vset.pattern.permute.xlu0 %v160_v3  ;;  %v25_v4 = vld [vmem:[%s200_s2] sm:$0xf]  ;;  %v24_v7 = vunpack.c.l.bf16 %v19_v5 }
   0x3   :  { %149 = vmatprep.subr.bf16.mxu0 %v157_v0  ;;  %28 = vperm.xlu0 %156, %v25_v4   ;;  %v14_v8 = vld [vmem:[%s201_s1] sm:$0xf] }
   0x6   :  { %151 = vmatpush3.bf16.msra.mxu0 %v126_v6 }
   0x7   :  { %141 = vmatprep.subr.mxu0 %v159_v2 }
   0xa   :  { %142 = vmatpush3.msk.msra.mxu0 %vm35_vm1, %v24_v7 }
   0xb   :  { %144 = vmatmul.mubr.msk.f32.vlgmr.msra.gmra.mrb[0].mxu0 %vm31_vm2, %v14_v8 }
  0x82   :  { %v29_v9 = vpop.permute.xlu0 %28 }
  0xde   :  { %v105_v10 = vpop.f32.mrb[0].mxu0 }
  0xdf   :  { %v106_v11 = vadd.f32 %v105_v10, %v29_v9  ;;  %v145_v12 = vpop.f32.mrb[1].mxu0 }
  0xe1   :  { %v109_v13 = vmax.f32 %v106_v11, 0.0 }
  0xe3   :  { %v110_v14 = vpack.c.bf16 %v109_v13, %v109_v13 }
  0xe5   :  { %111 = vst [vmem:[%s202_s3] sm:$0x3] %v110_v14 }

// kernel: unet_tiny_sum_forward.15
= control target key start
LH: loop header
LB: loop body
LE: loop exit
PB: predicated region body
PF: predicated region fallthrough
CT: control target
= control target key end

     0   :  { %v157_v0 = vmov 0.0|0.0   ;;  %vm158_vm0 = vmmov 0   ;;  %v159_v2 = vmov 0.0   ;;  %v160_v3 = vmov 0   ;;  %s199_s0 = inlined_call_operand.vmem [shape: bf16[36,128], index: 0, kind: input, shape index: {}]   ;;  %s200_s2 = inlined_call_operand.vmem [shape: f32[8,1], index: 2, kind: input, shape index: {}]   ;;  %s201_s1 = inlined_call_operand.vmem [shape: f32[8,36], index: 1, kind: input, shape index: {}]   ;;  %s202_s3 = inlined_call_operand.vmem [shape: bf16[8,128], index: 3, kind: output, shape index: {}]  }
   0x1   :  { %146 = vmatprep.subr.bf16.mxu0 %v157_v0  ;;  %v119_v1 = vld [vmem:[%s199_s0] sm:$0xff]   ;;  %143 = vmatprep.mubr.msk.f32.mxu0 %vm158_vm0, %v159_v2  ;;  %v19_v5 = vld [vmem:[%s199_s0 + $0x10] sm:$0x3]  ;;  %v126_v6 = vld [vmem:[%s199_s0 + $0x8] sm:$0xff]   ;;  %vm35_vm1 = vcmask 1043456   ;;  %vm31_vm2 = vcmask 293888  }
   0x2   :  { %148 = vmatpush3.bf16.msra.mxu0 %v119_v1  ;;  %156 = vset.pattern.permute.xlu0 %v160_v3  ;;  %v25_v4 = vld [vmem:[%s200_s2] sm:$0xff]  ;;  %v24_v7 = vunpack.c.l.bf16 %v19_v5 }
   0x3   :  { %149 = vmatprep.subr.bf16.mxu0 %v157_v0  ;;  %28 = vperm.xlu0 %156, %v25_v4   ;;  %v14_v8 = vld [vmem:[%s201_s1] sm:$0xff] }
   0x6   :  { %151 = vmatpush3.bf16.msra.mxu0 %v126_v6 }
   0x7   :  { %141 = vmatprep.subr.mxu0 %v159_v2 }
   0xa   :  { %142 = vmatpush3.msk.msra.mxu0 %vm35_vm1, %v24_v7 }
   0xb   :  { %144 = vmatmul.mubr.msk.f32.vlgmr.msra.gmra.mrb[0].mxu0 %vm31_vm2, %v14_v8 }
  0x82   :  { %v29_v9 = vpop.permute.xlu0 %28 }
  0xde   :  { %v105_v10 = vpop.f32.mrb[0].mxu0 }
  0xdf   :  { %v106_v11 = vadd.f32 %v105_v10, %v29_v9  ;;  %v145_v12 = vpop.f32.mrb[1].mxu0 }
  0xe1   :  { %v109_v13 = vmax.f32 %v106_v11, 0.0 }
  0xe3   :  { %v110_v14 = vpack.c.bf16 %v109_v13, %v109_v13 }
  0xe5   :  { %111 = vst [vmem:[%s202_s3] sm:$0xf] %v110_v14 }

// kernel: unet_tiny_sum_forward.16
= control target key start
LH: loop header
LB: loop body
LE: loop exit
PB: predicated region body
PF: predicated region fallthrough
CT: control target
= control target key end

     0   :  { %v188_v0 = vmov 0.0|0.0   ;;  %vm189_vm0 = vmmov 0   ;;  %v190_v2 = vmov 0.0   ;;  %v191_v3 = vmov 0   ;;  %s236_s0 = inlined_call_operand.vmem [shape: bf16[72,128], index: 0, kind: input, shape index: {}]   ;;  %s237_s2 = inlined_call_operand.vmem [shape: f32[8,1], index: 2, kind: input, shape index: {}]   ;;  %s238_s1 = inlined_call_operand.vmem [shape: f32[8,72], index: 1, kind: input, shape index: {}]   ;;  %s239_s3 = inlined_call_operand.vmem [shape: bf16[8,128], index: 3, kind: output, shape index: {}]  }
   0x1   :  { %171 = vmatprep.subr.bf16.mxu0 %v188_v0  ;;  %v122_v1 = vld [vmem:[%s236_s0] sm:$0xff]   ;;  %168 = vmatprep.mubr.msk.f32.mxu0 %vm189_vm0, %v190_v2  ;;  %v137_v4 = vld [vmem:[%s236_s0 + $0x8] sm:$0xff]   ;;  %v138_v6 = vld [vmem:[%s236_s0 + $0x10] sm:$0xff]   ;;  %vm39_vm1 = vcmask 588800  }
   0x2   :  { %173 = vmatpush3.bf16.msra.mxu0 %v122_v1  ;;  %187 = vset.pattern.permute.xlu0 %v191_v3  ;;  %v33_v5 = vld [vmem:[%s237_s2] sm:$0xff]  ;;  %v139_v7 = vld [vmem:[%s236_s0 + $0x18] sm:$0xff]  }
   0x3   :  { %174 = vmatprep.subr.bf16.mxu0 %v188_v0  ;;  %36 = vperm.xlu0 %187, %v33_v5   ;;  %v23_v8 = vld [vmem:[%s236_s0 + $0x20] sm:$0xf] }
   0x4   :  { %v32_v9 = vunpack.c.l.bf16 %v23_v8  ;;  %v14_v10 = vld [vmem:[%s238_s1] sm:$0xff] }
   0x6   :  { %176 = vmatpush3.bf16.msra.mxu0 %v137_v4 }
   0x7   :  { %177 = vmatprep.subr.bf16.mxu0 %v188_v0 }
   0xa   :  { %179 = vmatpush3.bf16.msra.mxu0 %v138_v6 }
   0xb   :  { %180 = vmatprep.subr.bf16.mxu0 %v188_v0 }
   0xe   :  { %182 = vmatpush3.bf16.msra.mxu0 %v139_v7 }
   0xf   :  { %166 = vmatprep.subr.mxu0 %v190_v2 }
  0x12   :  { %167 = vmatpush3.msra.mxu0 %v32_v9 }
  0x13   :  { %169 = vmatmul.mubr.msk.f32.vlgmr.msra.gmra.mrb[0].mxu0 %vm39_vm1, %v14_v10 }
  0x82   :  { %v37_v11 = vpop.permute.xlu0 %36 }
  0xe6   :  { %v109_v12 = vpop.f32.mrb[0].mxu0 }
  0xe7   :  { %v110_v13 = vadd.f32 %v109_v12, %v37_v11  ;;  %v170_v14 = vpop.f32.mrb[1].mxu0 }
  0xe9   :  { %v113_v15 = vmax.f32 %v110_v13, 0.0 }
  0xeb   :  { %v114_v16 = vpack.c.bf16 %v113_v15, %v113_v15 }
  0xed   :  { %115 = vst [vmem:[%s239_s3] sm:$0xf] %v114_v16 }

// kernel: unet_tiny_sum_forward.17
= control target key start
LH: loop header
LB: loop body
LE: loop exit
PB: predicated region body
PF: predicated region fallthrough
CT: control target
= control target key end

     0   :  { %vm46_vm0 = vcmask 588800   ;;  %v224_v2 = vmov 0   ;;  %s277_s0 = inlined_call_operand.vmem [shape: bf16[72,128], index: 0, kind: input, shape index: {}]   ;;  %s278_s1 = inlined_call_operand.vmem [shape: f32[16,72], index: 1, kind: input, shape index: {}]   ;;  %s279_s2 = inlined_call_operand.vmem [shape: f32[16,1], index: 2, kind: input, shape index: {}]   ;;  %s280_s3 = inlined_call_operand.vmem [shape: bf16[16,128], index: 3, kind: output, shape index: {}]  }
   0x1   :  { %v151_v0 = vld [vmem:[%s277_s0] sm:$0xff]   ;;  %v171_v1 = vld [vmem:[%s277_s0 + $0x8] sm:$0xff]   ;;  %223 = vset.pattern.permute.xlu0 %v224_v2  ;;  %v172_v5 = vld [vmem:[%s277_s0 + $0x10] sm:$0xff]  }
   0x2   :  { %207 = vmatprep.subr.bf16.mxu0 %v151_v0  ;;  %v14_v3 = vld [vmem:[%s278_s1] sm:$0xff]  ;;  %v35_v6 = vld [vmem:[%s279_s2 + $0x8] sm:$0xff]  ;;  %v173_v7 = vld [vmem:[%s277_s0 + $0x18] sm:$0xff]  }
   0x3   :  { %209 = vmatpush3.bf16.msra.mxu0 %v151_v0  ;;  %203 = vmatprep.mubr.msk.f32.mxu0 %vm46_vm0, %v14_v3  ;;  %v34_v4 = vld [vmem:[%s279_s2] sm:$0xff]  ;;  %v15_v10 = vld [vmem:[%s278_s1 + $0x8] sm:$0xff] }
   0x4   :  { %211 = vmatprep.subr.bf16.mxu0 %v171_v1  ;;  %38 = vperm.xlu0 %223, %v34_v4   ;;  %v24_v8 = vld [vmem:[%s277_s0 + $0x20] sm:$0xf] }
   0x5   :  { %v33_v9 = vunpack.c.l.bf16 %v24_v8 }
   0x7   :  { %213 = vmatpush3.bf16.msra.mxu0 %v171_v1 }
   0x8   :  { %215 = vmatprep.subr.bf16.mxu0 %v172_v5  ;;  %43 = vperm.xlu0 %223, %v35_v6  }
   0xb   :  { %217 = vmatpush3.bf16.msra.mxu0 %v172_v5 }
   0xc   :  { %219 = vmatprep.subr.bf16.mxu0 %v173_v7 }
   0xf   :  { %221 = vmatpush3.bf16.msra.mxu0 %v173_v7 }
  0x10   :  { %201 = vmatprep.subr.mxu0 %v33_v9 }
  0x13   :  { %202 = vmatpush3.msra.mxu0 %v33_v9 }
  0x14   :  { %204 = vmatmul.mubr.msk.f32.vlgmr.msra.gmra.mrb[0].mxu0 %vm46_vm0, %v15_v10 }
  0x83   :  { %v39_v11 = vpop.permute.xlu0 %38 }
  0x87   :  { %v44_v12 = vpop.permute.xlu0 %43 }
  0xe7   :  { %v205_v13 = vpop.f32.mrb[0].mxu0 }
  0xe8   :  { %v125_v14 = vadd.f32 %v205_v13, %v44_v12  ;;  %v119_v15 = vpop.f32.mrb[1].mxu0 }
  0xe9   :  { %v120_v16 = vadd.f32 %v119_v15, %v39_v11 }
  0xea   :  { %v129_v17 = vmax.f32 %v125_v14, 0.0 }
  0xeb   :  { %v128_v18 = vmax.f32 %v120_v16, 0.0 }
  0xed   :  { %v169_v19 = vpack.c.bf16 %v129_v17, %v128_v18 }
  0xef   :  { %170 = vst [vmem:[%s280_s3] sm:$0xff] %v169_v19  }

// kernel: unet_tiny_sum_forward.18
= control target key start
LH: loop header
LB: loop body
LE: loop exit
PB: predicated region body
PF: predicated region fallthrough
CT: control target
= control target key end

     0   :  { %v267_v0 = vmov 0.0|0.0   ;;  %vm66_vm0 = vcmask 130048   ;;  %v268_v5 = vmov 0   ;;  %s337_s0 = inlined_call_operand.vmem [shape: bf16[144,128], index: 0, kind: input, shape index: {}]   ;;  %s338_s1 = inlined_call_operand.vmem [shape: f32[16,144], index: 1, kind: input, shape index: {}]   ;;  %s339_s2 = inlined_call_operand.vmem [shape: f32[16,1], index: 2, kind: input, shape index: {}]   ;;  %s340_s3 = inlined_call_operand.vmem [shape: bf16[16,128], index: 3, kind: output, shape index: {}]  }
   0x1   :  { %219 = vmatprep.subr.bf16.mxu0 %v267_v0  ;;  %246 = vmatprep.subr.bf16.mxu1 %v267_v0  ;;  %v171_v1 = vld [vmem:[%s337_s0] sm:$0xff]   ;;  %v211_v2 = vld [vmem:[%s337_s0 + $0x8] sm:$0xff]   ;;  %v17_v4 = vld [vmem:[%s338_s1 + $0x18] sm:$0xff] }
   0x2   :  { %221 = vmatpush1.bf16.msra.mxu0 %v171_v1  ;;  %255 = vmatpush1.bf16.msra.mxu1 %v171_v1  ;;  %v15_v3 = vld [vmem:[%s338_s1 + $0x8] sm:$0xff]  ;;  %v54_v6 = vld [vmem:[%s339_s2] sm:$0xff]  ;;  %v212_v7 = vld [vmem:[%s337_s0 + $0x10] sm:$0xff]  }
   0x3   :  { %222 = vmatprep.subr.bf16.mxu0 %v267_v0  ;;  %247 = vmatprep.subr.bf16.mxu1 %v267_v0  ;;  %v55_v8 = vld [vmem:[%s339_s2 + $0x8] sm:$0xff]  ;;  %v213_v9 = vld [vmem:[%s337_s0 + $0x18] sm:$0xff]   ;;  %v214_v10 = vld [vmem:[%s337_s0 + $0x20] sm:$0xff]  }
   0x4   :  { %266 = vset.pattern.permute.xlu0 %v268_v5  ;;  %164 = vmatprep.mubr.msk.f32.mxu0 %vm66_vm0, %v15_v3  ;;  %v215_v11 = vld [vmem:[%s337_s0 + $0x28] sm:$0xff]   ;;  %v216_v12 = vld [vmem:[%s337_s0 + $0x30] sm:$0xff]   ;;  %v217_v13 = vld [vmem:[%s337_s0 + $0x38] sm:$0xff]  }
   0x5   :  { %165 = vmatprep.mubr.msk.f32.mxu1 %vm66_vm0, %v17_v4  ;;  %58 = vperm.xlu0 %266, %v54_v6   ;;  %v218_v14 = vld [vmem:[%s337_s0 + $0x40] sm:$0xff]   ;;  %v16_v16 = vld [vmem:[%s338_s1 + $0x10] sm:$0xff] }
   0x6   :  { %224 = vmatpush1.bf16.msra.mxu0 %v211_v2  ;;  %256 = vmatpush1.bf16.msra.mxu1 %v211_v2  ;;  %v14_v15 = vld [vmem:[%s338_s1] sm:$0xff] }
   0x7   :  { %225 = vmatprep.subr.bf16.mxu0 %v267_v0  ;;  %248 = vmatprep.subr.bf16.mxu1 %v267_v0 }
   0x9   :  { %63 = vperm.xlu0 %266, %v55_v8  }
   0xa   :  { %227 = vmatpush1.bf16.msra.mxu0 %v212_v7  ;;  %257 = vmatpush1.bf16.msra.mxu1 %v212_v7 }
   0xb   :  { %228 = vmatprep.subr.bf16.mxu0 %v267_v0  ;;  %249 = vmatprep.subr.bf16.mxu1 %v267_v0 }
   0xe   :  { %230 = vmatpush1.bf16.msra.mxu0 %v213_v9  ;;  %258 = vmatpush1.bf16.msra.mxu1 %v213_v9 }
   0xf   :  { %231 = vmatprep.subr.bf16.mxu0 %v267_v0  ;;  %250 = vmatprep.subr.bf16.mxu1 %v267_v0 }
  0x12   :  { %233 = vmatpush1.bf16.msra.mxu0 %v214_v10  ;;  %259 = vmatpush1.bf16.msra.mxu1 %v214_v10 }
  0x13   :  { %234 = vmatprep.subr.bf16.mxu0 %v267_v0  ;;  %251 = vmatprep.subr.bf16.mxu1 %v267_v0 }
  0x16   :  { %236 = vmatpush1.bf16.msra.mxu0 %v215_v11  ;;  %260 = vmatpush1.bf16.msra.mxu1 %v215_v11 }
  0x17   :  { %237 = vmatprep.subr.bf16.mxu0 %v267_v0  ;;  %252 = vmatprep.subr.bf16.mxu1 %v267_v0 }
  0x1a   :  { %239 = vmatpush1.bf16.msra.mxu0 %v216_v12  ;;  %261 = vmatpush1.bf16.msra.mxu1 %v216_v12 }
  0x1b   :  { %240 = vmatprep.subr.bf16.mxu0 %v267_v0  ;;  %253 = vmatprep.subr.bf16.mxu1 %v267_v0 }
  0x1e   :  { %242 = vmatpush1.bf16.msra.mxu0 %v217_v13  ;;  %262 = vmatpush1.bf16.msra.mxu1 %v217_v13 }
  0x1f   :  { %243 = vmatprep.subr.bf16.mxu0 %v267_v0  ;;  %254 = vmatprep.subr.bf16.mxu1 %v267_v0 }
  0x22   :  { %245 = vmatpush1.bf16.msra.mxu0 %v218_v14  ;;  %263 = vmatpush1.bf16.msra.mxu1 %v218_v14 }
  0x25   :  { %138 = vmatmul.mubr.f32.vlgmr.msra.gmra.mrb[0].mxu0 %v14_v15  ;;  %143 = vmatmul.mubr.f32.vlgmr.msra.gmra.mrb[0].mxu1 %v16_v16 }
  0x84   :  { %v59_v17 = vpop.permute.xlu0 %58 }
  0x88   :  { %v64_v18 = vpop.permute.xlu0 %63 }
  0xf8   :  { %v139_v19 = vpop.f32.mrb[0].mxu0  ;;  %v144_v20 = vpop.f32.mrb[0].mxu1 }
  0xf9   :  { %v140_v21 = vadd.f32 %v139_v19, %v59_v17  ;;  %v145_v22 = vadd.f32 %v144_v20, %v64_v18  ;;  %v141_v23 = vpop.f32.mrb[1].mxu0  ;;  %v146_v24 = vpop.f32.mrb[1].mxu1 }
  0xfb   :  { %v148_v25 = vmax.f32 %v140_v21, 0.0  ;;  %v149_v26 = vmax.f32 %v145_v22, 0.0 }
  0xfd   :  { %v209_v27 = vpack.c.bf16 %v149_v26, %v148_v25 }
  0xff   :  { %210 = vst [vmem:[%s340_s3] sm:$0xff] %v209_v27  }

// kernel: tile.14
= control target key start
LH: loop header
LB: loop body
LE: loop exit
PB: predicated region body
PF: predicated region fallthrough
CT: control target
= control target key end

     0   :  { %s22_s0 = inlined_call_operand.vmem [shape: f32[16], index: 0, kind: input, shape index: {}]   ;;  %s23_s1 = inlined_call_operand.vmem [shape: f32[4,1,1,16], index: 1, kind: output, shape index: {}]  }
   0x1   :  { %v4_v0 = vld [vmem:[%s22_s0] ss:$0 sm:$0xff] }
   0x2   :  { %5 = vst [vmem:[%s23_s1] sm:$0xf] %v4_v0 }

// kernel: tile.0
= control target key start
LH: loop header
LB: loop body
LE: loop exit
PB: predicated region body
PF: predicated region fallthrough
CT: control target
= control target key end

     0   :  { %s176_s8 = smov 125   ;;  %s177_s9 = smov 126   ;;  %vm7_vm0 = vcmask 7168   ;;  %s331_s0 = inlined_call_operand.vmem [shape: f32[4,1,1,16], index: 0, kind: input, shape index: {}]   ;;  %s332_s1 = inlined_call_operand.vmem [shape: f32[64,1], index: 1, kind: output, shape index: {}]  }
   0x1   :  { %v4_v0 = vld [vmem:[%s331_s0] sm:$0xf]  ;;  %s175_s0 = smov 127   ;;  %s178_s10 = smov 124  }
   0x2   :  { %5 = vst [vmem:[#allocation0] sm:$0xf] %v4_v0  ;;  %s179_s11 = smov 123   ;;  %s180_s12 = smov 122  }
   0x3   :  { %s181_s13 = smov 121   ;;  %s182_s14 = smov 120  }
   0x4   :  { %s183_s19 = smov 119   ;;  %s184_s20 = smov 118  }
   0x5   :  { %s185_s21 = smov 117   ;;  %s186_s22 = smov 116  }
   0x6   :  { %s187_s23 = smov 115   ;;  %s188_s24 = smov 114  }
   0x7   :  { %s189_s25 = smov 113  }
   0x9   :  { %v10_v1 = vld [vmem:[#allocation0] sm:$0xf]  }
   0xa   :  { %v26_v2 = vld [vmem:[#allocation0] sm:$0xf]   ;;  %11 = vrot.lane.b32.xlu0 %v10_v1, %s175_s0 }
   0xb   :  { %27 = vrot.lane.b32.xlu1 %v26_v2, %s176_s8  ;;  %v18_v3 = vld [vmem:[#allocation0] sm:$0xf]  }
   0xc   :  { %v34_v4 = vld [vmem:[#allocation0] sm:$0xf]  }
   0xd   :  { %v42_v5 = vld [vmem:[#allocation0] sm:$0xf]  }
   0xe   :  { %19 = vrot.lane.b32.xlu0 %v18_v3, %s177_s9  ;;  %v50_v6 = vld [vmem:[#allocation0] sm:$0xf]  }
   0xf   :  { %35 = vrot.lane.b32.xlu1 %v34_v4, %s178_s10  ;;  %v58_v7 = vld [vmem:[#allocation0] sm:$0xf]  }
  0x10   :  { %v66_v8 = vld [vmem:[#allocation0] sm:$0xf]  }
  0x11   :  { %v74_v9 = vld [vmem:[#allocation0] sm:$0xf]  }
  0x12   :  { %43 = vrot.lane.b32.xlu0 %v42_v5, %s179_s11  ;;  %v82_v10 = vld [vmem:[#allocation0] sm:$0xf]  }
  0x13   :  { %51 = vrot.lane.b32.xlu1 %v50_v6, %s180_s12  ;;  %v6_v11 = vld [vmem:[#allocation0] sm:$0xf]  }
  0x14   :  { %8 = vst.msk [vmem:[%s332_s1] ss:$16 sm:$0x3] %vm7_vm0, %v6_v11   ;;  %9 = vst.msk [vmem:[%s332_s1] ss:$16 sm:$0xc] %vm7_vm0, %v6_v11  }
  0x15   :  { %v90_v12 = vld [vmem:[#allocation0] sm:$0xf]  }
  0x16   :  { %59 = vrot.lane.b32.xlu0 %v58_v7, %s181_s13  ;;  %v98_v13 = vld [vmem:[#allocation0] sm:$0xf]  }
  0x17   :  { %67 = vrot.lane.b32.xlu1 %v66_v8, %s182_s14  ;;  %v106_v14 = vld [vmem:[#allocation0] sm:$0xf]  }
  0x18   :  { %v114_v15 = vld [vmem:[#allocation0] sm:$0xf]  }
  0x19   :  { %v122_v16 = vld [vmem:[#allocation0] sm:$0xf]  }
  0x1a   :  { %75 = vrot.lane.b32.xlu0 %v74_v9, %s183_s19 }
  0x1b   :  { %83 = vrot.lane.b32.xlu1 %v82_v10, %s184_s20 }
  0x1e   :  { %91 = vrot.lane.b32.xlu0 %v90_v12, %s185_s21 }
  0x1f   :  { %99 = vrot.lane.b32.xlu1 %v98_v13, %s186_s22 }
  0x22   :  { %107 = vrot.lane.b32.xlu0 %v106_v14, %s187_s23 }
  0x23   :  { %115 = vrot.lane.b32.xlu1 %v114_v15, %s188_s24 }
  0x26   :  { %123 = vrot.lane.b32.xlu0 %v122_v16, %s189_s25 }
  0x7c   :  { %v12_v17 = vpop.permute.xlu0 %11  }
  0x7d   :  { %v28_v18 = vpop.permute.xlu1 %27   ;;  %130 = vst.msk [vmem:[%s332_s1 + $0x1] ss:$16 sm:$0x3] %vm7_vm0, %v12_v17   ;;  %131 = vst.msk [vmem:[%s332_s1 + $0x1] ss:$16 sm:$0xc] %vm7_vm0, %v12_v17  }
  0x7e   :  { %134 = vst.msk [vmem:[%s332_s1 + $0x3] ss:$16 sm:$0x3] %vm7_vm0, %v28_v18   ;;  %135 = vst.msk [vmem:[%s332_s1 + $0x3] ss:$16 sm:$0xc] %vm7_vm0, %v28_v18  }
  0x80   :  { %v20_v19 = vpop.permute.xlu0 %19  }
  0x81   :  { %v36_v20 = vpop.permute.xlu1 %35   ;;  %132 = vst.msk [vmem:[%s332_s1 + $0x2] ss:$16 sm:$0x3] %vm7_vm0, %v20_v19   ;;  %133 = vst.msk [vmem:[%s332_s1 + $0x2] ss:$16 sm:$0xc] %vm7_vm0, %v20_v19  }
  0x82   :  { %136 = vst.msk [vmem:[%s332_s1 + $0x4] ss:$16 sm:$0x3] %vm7_vm0, %v36_v20   ;;  %137 = vst.msk [vmem:[%s332_s1 + $0x4] ss:$16 sm:$0xc] %vm7_vm0, %v36_v20  }
  0x84   :  { %v44_v21 = vpop.permute.xlu0 %43  }
  0x85   :  { %v52_v22 = vpop.permute.xlu1 %51   ;;  %138 = vst.msk [vmem:[%s332_s1 + $0x5] ss:$16 sm:$0x3] %vm7_vm0, %v44_v21   ;;  %139 = vst.msk [vmem:[%s332_s1 + $0x5] ss:$16 sm:$0xc] %vm7_vm0, %v44_v21  }
  0x86   :  { %140 = vst.msk [vmem:[%s332_s1 + $0x6] ss:$16 sm:$0x3] %vm7_vm0, %v52_v22   ;;  %141 = vst.msk [vmem:[%s332_s1 + $0x6] ss:$16 sm:$0xc] %vm7_vm0, %v52_v22  }
  0x88   :  { %v60_v23 = vpop.permute.xlu0 %59  }
  0x89   :  { %v68_v24 = vpop.permute.xlu1 %67   ;;  %142 = vst.msk [vmem:[%s332_s1 + $0x7] ss:$16 sm:$0x3] %vm7_vm0, %v60_v23   ;;  %143 = vst.msk [vmem:[%s332_s1 + $0x7] ss:$16 sm:$0xc] %vm7_vm0, %v60_v23  }
  0x8a   :  { %144 = vst.msk [vmem:[%s332_s1 + $0x8] ss:$16 sm:$0x3] %vm7_vm0, %v68_v24   ;;  %145 = vst.msk [vmem:[%s332_s1 + $0x8] ss:$16 sm:$0xc] %vm7_vm0, %v68_v24  }
  0x8c   :  { %v76_v25 = vpop.permute.xlu0 %75  }
  0x8d   :  { %v84_v26 = vpop.permute.xlu1 %83   ;;  %146 = vst.msk [vmem:[%s332_s1 + $0x9] ss:$16 sm:$0x3] %vm7_vm0, %v76_v25   ;;  %147 = vst.msk [vmem:[%s332_s1 + $0x9] ss:$16 sm:$0xc] %vm7_vm0, %v76_v25  }
  0x8e   :  { %148 = vst.msk [vmem:[%s332_s1 + $0xa] ss:$16 sm:$0x3] %vm7_vm0, %v84_v26   ;;  %149 = vst.msk [vmem:[%s332_s1 + $0xa] ss:$16 sm:$0xc] %vm7_vm0, %v84_v26  }
  0x90   :  { %v92_v27 = vpop.permute.xlu0 %91  }
  0x91   :  { %v100_v28 = vpop.permute.xlu1 %99   ;;  %150 = vst.msk [vmem:[%s332_s1 + $0xb] ss:$16 sm:$0x3] %vm7_vm0, %v92_v27   ;;  %151 = vst.msk [vmem:[%s332_s1 + $0xb] ss:$16 sm:$0xc] %vm7_vm0, %v92_v27  }
  0x92   :  { %152 = vst.msk [vmem:[%s332_s1 + $0xc] ss:$16 sm:$0x3] %vm7_vm0, %v100_v28   ;;  %153 = vst.msk [vmem:[%s332_s1 + $0xc] ss:$16 sm:$0xc] %vm7_vm0, %v100_v28  }
  0x94   :  { %v108_v29 = vpop.permute.xlu0 %107  }
  0x95   :  { %v116_v30 = vpop.permute.xlu1 %115   ;;  %154 = vst.msk [vmem:[%s332_s1 + $0xd] ss:$16 sm:$0x3] %vm7_vm0, %v108_v29   ;;  %155 = vst.msk [vmem:[%s332_s1 + $0xd] ss:$16 sm:$0xc] %vm7_vm0, %v108_v29  }
  0x96   :  { %156 = vst.msk [vmem:[%s332_s1 + $0xe] ss:$16 sm:$0x3] %vm7_vm0, %v116_v30   ;;  %157 = vst.msk [vmem:[%s332_s1 + $0xe] ss:$16 sm:$0xc] %vm7_vm0, %v116_v30  }
  0x98   :  { %v124_v31 = vpop.permute.xlu0 %123  }
  0x99   :  { %158 = vst.msk [vmem:[%s332_s1 + $0xf] ss:$16 sm:$0x3] %vm7_vm0, %v124_v31   ;;  %159 = vst.msk [vmem:[%s332_s1 + $0xf] ss:$16 sm:$0xc] %vm7_vm0, %v124_v31  }

// kernel: unet_tiny_sum_forward.19
= control target key start
LH: loop header
LB: loop body
LE: loop exit
PB: predicated region body
PF: predicated region fallthrough
CT: control target
= control target key end

     0   :  { %v1188_v0 = vmov 0.0|0.0   ;;  %v1189_v2 = vmov 0   ;;  %vm88_vm0 = vcmask 130048   ;;  %vm218_vm1 = vcmask 261120   ;;  %s1453_s0 = inlined_call_operand.vmem [shape: bf16[144,128], index: 0, kind: input, shape index: {}]   ;;  %s1454_s1 = inlined_call_operand.vmem [shape: f32[32,144], index: 1, kind: input, shape index: {}]   ;;  %s1455_s2 = inlined_call_operand.vmem [shape: f32[32,1], index: 2, kind: input, shape index: {}]   ;;  %s1456_s4 = inlined_call_operand.vmem [shape: f32[5,32,1], index: 4, kind: input, shape index: {}]   ;;  %s1457_s3 = inlined_call_operand.vmem [shape: f32[5,32,32], index: 3, kind: input, shape index: {}]   ;;  %s1458_s5 = inlined_call_operand.vmem [shape: bf16[32,128], index: 5, kind: output, shape index: {}]  }
   0x1   :  { %1117 = vmatprep.subr.bf16.mxu0 %v1188_v0  ;;  %v953_v1 = vld [vmem:[%s1453_s0] sm:$0xff]   ;;  %1186 = vset.pattern.permute.xlu0 %v1189_v2  ;;  %v998_v3 = vld [vmem:[%s1453_s0 + $0x8] sm:$0xff]   ;;  %v999_v6 = vld [vmem:[%s1453_s0 + $0x10] sm:$0xff]  }
   0x2   :  { %1119 = vmatpush1.bf16.msra.mxu0 %v953_v1  ;;  %1187 = vset.pattern.permute.xlu1 %v1189_v2  ;;  %v21_v4 = vld [vmem:[%s1454_s1 + $0x8] sm:$0xff]  ;;  %v64_v5 = vld [vmem:[%s1455_s2] sm:$0xff]  ;;  %v66_v7 = vld [vmem:[%s1455_s2 + $0x10] sm:$0xff] }
   0x3   :  { %1120 = vmatprep.subr.bf16.mxu0 %v1188_v0  ;;  %888 = vmatprep.mubr.msk.f32.mxu0 %vm88_vm0, %v21_v4  ;;  %v65_v8 = vld [vmem:[%s1455_s2 + $0x8] sm:$0xff]  ;;  %v67_v9 = vld [vmem:[%s1455_s2 + $0x18] sm:$0xff]  ;;  %v194_v11 = vld [vmem:[%s1456_s4] sm:$0xff] }
   0x4   :  { %70 = vperm.xlu0 %1186, %v64_v5   ;;  %80 = vperm.xlu1 %1187, %v66_v7   ;;  %v1000_v10 = vld [vmem:[%s1453_s0 + $0x18] sm:$0xff]   ;;  %v195_v12 = vld [vmem:[%s1456_s4 + $0x8] sm:$0xff]  ;;  %v1001_v13 = vld [vmem:[%s1453_s0 + $0x20] sm:$0xff]  }
   0x5   :  { %v196_v14 = vld [vmem:[%s1456_s4 + $0x10] sm:$0xff]  ;;  %v197_v15 = vld [vmem:[%s1456_s4 + $0x18] sm:$0xff]  ;;  %v1002_v16 = vld [vmem:[%s1453_s0 + $0x28] sm:$0xff]  }
   0x6   :  { %1122 = vmatpush1.bf16.msra.mxu0 %v998_v3  ;;  %v900_v17 = vld [vmem:[%s1456_s4 + $0x20] sm:$0xff]  ;;  %v901_v18 = vld [vmem:[%s1456_s4 + $0x28] sm:$0xff]  ;;  %v1003_v19 = vld [vmem:[%s1453_s0 + $0x30] sm:$0xff]  }
   0x7   :  { %1123 = vmatprep.subr.bf16.mxu0 %v1188_v0  ;;  %v902_v20 = vld [vmem:[%s1456_s4 + $0x30] sm:$0xff]  ;;  %v903_v21 = vld [vmem:[%s1456_s4 + $0x38] sm:$0xff]  ;;  %v912_v23 = vld [vmem:[%s1456_s4 + $0x40] sm:$0xff] }
   0x8   :  { %75 = vperm.xlu0 %1186, %v65_v8   ;;  %85 = vperm.xlu1 %1187, %v67_v9   ;;  %v1004_v22 = vld [vmem:[%s1453_s0 + $0x38] sm:$0xff]   ;;  %v913_v24 = vld [vmem:[%s1456_s4 + $0x48] sm:$0xff]  ;;  %v1005_v25 = vld [vmem:[%s1453_s0 + $0x40] sm:$0xff]  }
   0x9   :  { %v914_v26 = vld [vmem:[%s1456_s4 + $0x50] sm:$0xff]  ;;  %v915_v27 = vld [vmem:[%s1456_s4 + $0x58] sm:$0xff]  ;;  %v20_v28 = vld [vmem:[%s1454_s1] sm:$0xff] }
   0xa   :  { %1125 = vmatpush1.bf16.msra.mxu0 %v999_v6  ;;  %v23_v29 = vld [vmem:[%s1454_s1 + $0x18] sm:$0xff]  ;;  %v924_v30 = vld [vmem:[%s1456_s4 + $0x60] sm:$0xff]  ;;  %v925_v31 = vld [vmem:[%s1456_s4 + $0x68] sm:$0xff] }
   0xb   :  { %1126 = vmatprep.subr.bf16.mxu0 %v1188_v0  ;;  %v22_v32 = vld [vmem:[%s1454_s1 + $0x10] sm:$0xff]  ;;  %v25_v33 = vld [vmem:[%s1454_s1 + $0x28] sm:$0xff]  ;;  %v927_v35 = vld [vmem:[%s1456_s4 + $0x78] sm:$0xff] }
   0xc   :  { %200 = vperm.xlu0 %1186, %v194_v11   ;;  %205 = vperm.xlu1 %1187, %v195_v12   ;;  %v926_v34 = vld [vmem:[%s1456_s4 + $0x70] sm:$0xff]  ;;  %v24_v36 = vld [vmem:[%s1454_s1 + $0x20] sm:$0xff]  ;;  %v27_v37 = vld [vmem:[%s1454_s1 + $0x38] sm:$0xff] }
   0xd   :  { %v936_v38 = vld [vmem:[%s1456_s4 + $0x80] sm:$0xff]  ;;  %v937_v39 = vld [vmem:[%s1456_s4 + $0x88] sm:$0xff]  ;;  %v26_v40 = vld [vmem:[%s1454_s1 + $0x30] sm:$0xff] }
   0xe   :  { %1128 = vmatpush1.bf16.msra.mxu0 %v1000_v10  ;;  %v938_v41 = vld [vmem:[%s1456_s4 + $0x90] sm:$0xff]  ;;  %v939_v42 = vld [vmem:[%s1456_s4 + $0x98] sm:$0xff]  ;;  %v190_v43 = vld [vmem:[%s1457_s3] sm:$0xff] }
   0xf   :  { %1129 = vmatprep.subr.bf16.mxu0 %v1188_v0  ;;  %1055 = vmatprep.mubr.msk.f32.mxu1 %vm218_vm1, %v190_v43  ;;  %v191_v2 = vld [vmem:[%s1457_s3 + $0x8] sm:$0xff]  ;;  %v192_v3 = vld [vmem:[%s1457_s3 + $0x10] sm:$0xff]  ;;  %v193_v4 = vld [vmem:[%s1457_s3 + $0x18] sm:$0xff] }
  0x10   :  { %210 = vperm.xlu0 %1186, %v196_v14   ;;  %215 = vperm.xlu1 %1187, %v197_v15   ;;  %v896_v5 = vld [vmem:[%s1457_s3 + $0x20] sm:$0xff] }
  0x12   :  { %1131 = vmatpush1.bf16.msra.mxu0 %v1001_v13 }
  0x13   :  { %1132 = vmatprep.subr.bf16.mxu0 %v1188_v0 }
  0x14   :  { %336 = vperm.xlu0 %1186, %v900_v17   ;;  %341 = vperm.xlu1 %1187, %v901_v18  }
  0x16   :  { %1134 = vmatpush1.bf16.msra.mxu0 %v1002_v16 }
  0x17   :  { %1135 = vmatprep.subr.bf16.mxu0 %v1188_v0 }
  0x18   :  { %346 = vperm.xlu0 %1186, %v902_v20   ;;  %351 = vperm.xlu1 %1187, %v903_v21  }
  0x1a   :  { %1137 = vmatpush1.bf16.msra.mxu0 %v1003_v19 }
  0x1b   :  { %1138 = vmatprep.subr.bf16.mxu0 %v1188_v0 }
  0x1c   :  { %471 = vperm.xlu0 %1186, %v912_v23   ;;  %476 = vperm.xlu1 %1187, %v913_v24   ;;  %v897_v24 = vld [vmem:[%s1457_s3 + $0x28] sm:$0xff] }
  0x1e   :  { %1140 = vmatpush1.bf16.msra.mxu0 %v1004_v22 }
  0x1f   :  { %1141 = vmatprep.subr.bf16.mxu0 %v1188_v0 }
  0x20   :  { %481 = vperm.xlu0 %1186, %v914_v26   ;;  %486 = vperm.xlu1 %1187, %v915_v27   ;;  %v899_v26 = vld [vmem:[%s1457_s3 + $0x38] sm:$0xff]  ;;  %v908_v27 = vld [vmem:[%s1457_s3 + $0x40] sm:$0xff] }
  0x22   :  { %1143 = vmatpush1.bf16.msra.mxu0 %v1005_v25  ;;  %v898_v25 = vld [vmem:[%s1457_s3 + $0x30] sm:$0xff] }
  0x24   :  { %606 = vperm.xlu0 %1186, %v924_v30   ;;  %611 = vperm.xlu1 %1187, %v925_v31  }
  0x25   :  { %166 = vmatmul.mubr.f32.vlgmr.msra.gmra.mrb[0].mxu0 %v20_v28 }
  0x26   :  { %889 = vmatprep.mubr.msk.f32.mxu0 %vm88_vm0, %v23_v29 }
  0x28   :  { %616 = vperm.xlu0 %1186, %v926_v34   ;;  %621 = vperm.xlu1 %1187, %v927_v35  }
  0x29   :  { %171 = vmatmul.mubr.f32.gmra.mrb[2].mxu0 %v22_v32 }
  0x2a   :  { %890 = vmatprep.mubr.msk.f32.mxu0 %vm88_vm0, %v25_v33 }
  0x2c   :  { %741 = vperm.xlu0 %1186, %v936_v38   ;;  %746 = vperm.xlu1 %1187, %v937_v39  }
  0x2d   :  { %176 = vmatmul.mubr.f32.gmra.mrb[4].mxu0 %v24_v36 }
  0x2e   :  { %891 = vmatprep.mubr.msk.f32.mxu0 %vm88_vm0, %v27_v37 }
  0x30   :  { %751 = vperm.xlu0 %1186, %v938_v41   ;;  %756 = vperm.xlu1 %1187, %v939_v42  }
  0x31   :  { %181 = vmatmul.mubr.f32.gmra.mrb[6].mxu0 %v26_v40 }
  0x83   :  { %v71_v44 = vpop.permute.xlu0 %70  ;;  %v81_v52 = vpop.permute.xlu1 %80 }
  0x87   :  { %v76_v48 = vpop.permute.xlu0 %75  ;;  %v86_v59 = vpop.permute.xlu1 %85 }
  0x8b   :  { %v206_v6 = vpop.permute.xlu1 %205  ;;  %v201_v7 = vpop.permute.xlu0 %200 }
  0x8f   :  { %v216_v13 = vpop.permute.xlu1 %215  ;;  %v211_v16 = vpop.permute.xlu0 %210 }
  0x93   :  { %v342_v28 = vpop.permute.xlu1 %341  ;;  %v337_v29 = vpop.permute.xlu0 %336 }
  0x97   :  { %v352_v36 = vpop.permute.xlu1 %351  ;;  %v347_v40 = vpop.permute.xlu0 %346 }
  0xf8   :  { %v167_v45 = vpop.f32.mrb[0].mxu0 }
  0xf9   :  { %v169_v46 = vpop.f32.mrb[1].mxu0  ;;  %v1351_v47 = vadd.f32 %v167_v45, %v71_v44 }
  0xfb   :  { %v186_v53 = vmax.f32 %v1351_v47, 0.0 }
  0xfc   :  { %v172_v49 = vpop.f32.mrb[2].mxu0 }
  0xfd   :  { %v1353_v50 = vadd.f32 %v172_v49, %v76_v48  ;;  %v174_v51 = vpop.f32.mrb[3].mxu0 }
  0xff   :  { %v187_v54 = vmax.f32 %v1353_v50, 0.0 }
 0x100   :  { %v177_v55 = vpop.f32.mrb[4].mxu0 }
 0x101   :  { %v179_v56 = vpop.f32.mrb[5].mxu0  ;;  %v1144_v57 = vpack.c.bf16 %v187_v54, %v186_v53  ;;  %v1359_v58 = vadd.f32 %v177_v55, %v81_v52  ;;  %v910_v55 = vld [vmem:[%s1457_s3 + $0x50] sm:$0xff] }
 0x102   :  { %v911_v56 = vld [vmem:[%s1457_s3 + $0x58] sm:$0xff] }
 0x103   :  { %1145 = vmatprep.subr.bf16.mxu1 %v1144_v57  ;;  %v188_v63 = vmax.f32 %v1359_v58, 0.0  ;;  %v477_v58 = vpop.permute.xlu1 %476 }
 0x104   :  { %v182_v60 = vpop.f32.mrb[6].mxu0  ;;  %1147 = vmatpush3.bf16.msra.mxu1 %v1144_v57  ;;  %v920_v57 = vld [vmem:[%s1457_s3 + $0x60] sm:$0xff] }
 0x105   :  { %v1361_v61 = vadd.f32 %v182_v60, %v86_v59  ;;  %v184_v62 = vpop.f32.mrb[7].mxu0  ;;  %v472_v59 = vpop.permute.xlu0 %471 }
 0x107   :  { %v189_v0 = vmax.f32 %v1361_v61, 0.0 }
 0x109   :  { %v1148_v1 = vpack.c.bf16 %v189_v0, %v188_v63 }
 0x10b   :  { %1149 = vmatprep.subr.bf16.mxu1 %v1148_v1 }
 0x10c   :  { %1151 = vmatpush3.bf16.msra.mxu1 %v1148_v1  ;;  %v487_v1 = vpop.permute.xlu1 %486 }
 0x10f   :  { %1056 = vmatmul.mubr.msk.f32.vlgmr.msra.gmra.mrb[0].mxu1 %vm218_vm1, %v191_v2 }
 0x110   :  { %1058 = vmatprep.mubr.msk.f32.mxu1 %vm218_vm1, %v192_v3 }
 0x113   :  { %1059 = vmatmul.mubr.msk.f32.gmra.mrb[2].mxu1 %vm218_vm1, %v193_v4  ;;  %v482_v4 = vpop.permute.xlu0 %481 }
 0x114   :  { %1069 = vmatprep.mubr.msk.f32.mxu1 %vm218_vm1, %v896_v5 }
 0x1e2   :  { %v1057_v8 = vpop.f32.mrb[0].mxu1 }
 0x1e3   :  { %v303_v9 = vadd.f32 %v1057_v8, %v206_v6  ;;  %v297_v10 = vpop.f32.mrb[1].mxu1 }
 0x1e4   :  { %v298_v11 = vadd.f32 %v297_v10, %v201_v7 }
 0x1e5   :  { %v317_v12 = vmax.f32 %v303_v9, 0.0 }
 0x1e6   :  { %v316_v14 = vmax.f32 %v298_v11, 0.0  ;;  %v1060_v15 = vpop.f32.mrb[2].mxu1 }
 0x1e7   :  { %v313_v17 = vadd.f32 %v1060_v15, %v216_v13  ;;  %v307_v18 = vpop.f32.mrb[3].mxu1  ;;  %v321_v34 = vadd.f32 %v317_v12, %v187_v54  ;;  %v909_v54 = vld [vmem:[%s1457_s3 + $0x48] sm:$0xff] }
 0x1e8   :  { %v1152_v19 = vpack.c.bf16 %v317_v12, %v316_v14  ;;  %v308_v20 = vadd.f32 %v307_v18, %v211_v16  ;;  %v320_v37 = vadd.f32 %v316_v14, %v186_v53  ;;  %v921_v16 = vld [vmem:[%s1457_s3 + $0x68] sm:$0xff]  ;;  %v923_v18 = vld [vmem:[%s1457_s3 + $0x78] sm:$0xff] }
 0x1e9   :  { %v319_v21 = vmax.f32 %v313_v17, 0.0  ;;  %v922_v17 = vld [vmem:[%s1457_s3 + $0x70] sm:$0xff] }
 0x1ea   :  { %v318_v22 = vmax.f32 %v308_v20, 0.0  ;;  %1153 = vmatprep.subr.bf16.mxu1 %v1152_v19  ;;  %v612_v20 = vpop.permute.xlu1 %611 }
 0x1eb   :  { %1155 = vmatpush3.bf16.msra.mxu1 %v1152_v19  ;;  %v323_v48 = vadd.f32 %v319_v21, %v189_v0  ;;  %v932_v19 = vld [vmem:[%s1457_s3 + $0x80] sm:$0xff] }
 0x1ec   :  { %v1156_v23 = vpack.c.bf16 %v319_v21, %v318_v22  ;;  %v322_v50 = vadd.f32 %v318_v22, %v188_v63  ;;  %v607_v21 = vpop.permute.xlu0 %606 }
 0x1ee   :  { %1157 = vmatprep.subr.bf16.mxu1 %v1156_v23 }
 0x1ef   :  { %1159 = vmatpush3.bf16.msra.mxu1 %v1156_v23 }
 0x1f2   :  { %1070 = vmatmul.mubr.msk.f32.vlgmr.msra.gmra.mrb[4].mxu1 %vm218_vm1, %v897_v24 }
 0x1f3   :  { %1072 = vmatprep.mubr.msk.f32.mxu1 %vm218_vm1, %v898_v25 }
 0x1f6   :  { %1073 = vmatmul.mubr.msk.f32.gmra.mrb[6].mxu1 %vm218_vm1, %v899_v26 }
 0x1f7   :  { %1083 = vmatprep.mubr.msk.f32.mxu1 %vm218_vm1, %v908_v27  ;;  %v622_v27 = vpop.permute.xlu1 %621 }
 0x2c5   :  { %v1071_v30 = vpop.f32.mrb[4].mxu1 }
 0x2c6   :  { %v438_v31 = vadd.f32 %v1071_v30, %v342_v28  ;;  %v432_v32 = vpop.f32.mrb[5].mxu1  ;;  %v617_v30 = vpop.permute.xlu0 %616 }
 0x2c7   :  { %v433_v33 = vadd.f32 %v432_v32, %v337_v29 }
 0x2c8   :  { %v452_v35 = vmax.f32 %v438_v31, 0.0 }
 0x2c9   :  { %v451_v38 = vmax.f32 %v433_v33, 0.0  ;;  %v1074_v39 = vpop.f32.mrb[6].mxu1 }
 0x2ca   :  { %v456_v41 = vadd.f32 %v452_v35, %v321_v34  ;;  %v448_v42 = vadd.f32 %v1074_v39, %v352_v36  ;;  %v442_v43 = vpop.f32.mrb[7].mxu1 }
 0x2cb   :  { %v455_v44 = vadd.f32 %v451_v38, %v320_v37  ;;  %v1160_v45 = vpack.c.bf16 %v452_v35, %v451_v38  ;;  %v443_v46 = vadd.f32 %v442_v43, %v347_v40  ;;  %v934_v43 = vld [vmem:[%s1457_s3 + $0x90] sm:$0xff] }
 0x2cc   :  { %v454_v49 = vmax.f32 %v448_v42, 0.0  ;;  %v933_v42 = vld [vmem:[%s1457_s3 + $0x88] sm:$0xff] }
 0x2cd   :  { %v453_v51 = vmax.f32 %v443_v46, 0.0  ;;  %1161 = vmatprep.subr.bf16.mxu1 %v1160_v45  ;;  %v742_v46 = vpop.permute.xlu0 %741 }
 0x2ce   :  { %v458_v52 = vadd.f32 %v454_v49, %v323_v48  ;;  %1163 = vmatpush3.bf16.msra.mxu1 %v1160_v45  ;;  %v747_v45 = vpop.permute.xlu1 %746 }
 0x2cf   :  { %v457_v47 = vadd.f32 %v453_v51, %v322_v50  ;;  %v1164_v53 = vpack.c.bf16 %v454_v49, %v453_v51 }
 0x2d1   :  { %1165 = vmatprep.subr.bf16.mxu1 %v1164_v53 }
 0x2d2   :  { %1167 = vmatpush3.bf16.msra.mxu1 %v1164_v53 }
 0x2d5   :  { %1084 = vmatmul.mubr.msk.f32.vlgmr.msra.gmra.mrb[8].mxu1 %vm218_vm1, %v909_v54 }
 0x2d6   :  { %1086 = vmatprep.mubr.msk.f32.mxu1 %vm218_vm1, %v910_v55  ;;  %v752_v55 = vpop.permute.xlu0 %751 }
 0x2d9   :  { %1087 = vmatmul.mubr.msk.f32.gmra.mrb[10].mxu1 %vm218_vm1, %v911_v56 }
 0x2da   :  { %1097 = vmatprep.mubr.msk.f32.mxu1 %vm218_vm1, %v920_v57 }
 0x3a8   :  { %v1085_v60 = vpop.f32.mrb[8].mxu1 }
 0x3a9   :  { %v573_v61 = vadd.f32 %v1085_v60, %v477_v58  ;;  %v567_v62 = vpop.f32.mrb[9].mxu1 }
 0x3aa   :  { %v568_v63 = vadd.f32 %v567_v62, %v472_v59 }
 0x3ab   :  { %v587_v0 = vmax.f32 %v573_v61, 0.0 }
 0x3ac   :  { %v586_v2 = vmax.f32 %v568_v63, 0.0  ;;  %v1088_v3 = vpop.f32.mrb[10].mxu1 }
 0x3ad   :  { %v591_v5 = vadd.f32 %v587_v0, %v456_v41  ;;  %v583_v6 = vadd.f32 %v1088_v3, %v487_v1  ;;  %v577_v7 = vpop.f32.mrb[11].mxu1 }
 0x3ae   :  { %v590_v8 = vadd.f32 %v586_v2, %v455_v44  ;;  %v1168_v9 = vpack.c.bf16 %v587_v0, %v586_v2  ;;  %v578_v10 = vadd.f32 %v577_v7, %v482_v4  ;;  %v935_v44 = vld [vmem:[%s1457_s3 + $0x98] sm:$0xff] }
 0x3af   :  { %v589_v11 = vmax.f32 %v583_v6, 0.0 }
 0x3b0   :  { %v588_v12 = vmax.f32 %v578_v10, 0.0  ;;  %1169 = vmatprep.subr.bf16.mxu1 %v1168_v9 }
 0x3b1   :  { %v593_v13 = vadd.f32 %v589_v11, %v458_v52  ;;  %1171 = vmatpush3.bf16.msra.mxu1 %v1168_v9 }
 0x3b2   :  { %v592_v14 = vadd.f32 %v588_v12, %v457_v47  ;;  %v1172_v15 = vpack.c.bf16 %v589_v11, %v588_v12  ;;  %v757_v47 = vpop.permute.xlu1 %756 }
 0x3b4   :  { %1173 = vmatprep.subr.bf16.mxu1 %v1172_v15 }
 0x3b5   :  { %1175 = vmatpush3.bf16.msra.mxu1 %v1172_v15 }
 0x3b8   :  { %1098 = vmatmul.mubr.msk.f32.vlgmr.msra.gmra.mrb[12].mxu1 %vm218_vm1, %v921_v16 }
 0x3b9   :  { %1100 = vmatprep.mubr.msk.f32.mxu1 %vm218_vm1, %v922_v17 }
 0x3bc   :  { %1101 = vmatmul.mubr.msk.f32.gmra.mrb[14].mxu1 %vm218_vm1, %v923_v18 }
 0x3bd   :  { %1111 = vmatprep.mubr.msk.f32.mxu1 %vm218_vm1, %v932_v19 }
 0x48b   :  { %v1099_v22 = vpop.f32.mrb[12].mxu1 }
 0x48c   :  { %v708_v23 = vadd.f32 %v1099_v22, %v612_v20  ;;  %v702_v24 = vpop.f32.mrb[13].mxu1 }
 0x48d   :  { %v703_v25 = vadd.f32 %v702_v24, %v607_v21 }
 0x48e   :  { %v722_v26 = vmax.f32 %v708_v23, 0.0 }
 0x48f   :  { %v721_v28 = vmax.f32 %v703_v25, 0.0  ;;  %v1102_v29 = vpop.f32.mrb[14].mxu1 }
 0x490   :  { %v726_v31 = vadd.f32 %v722_v26, %v591_v5  ;;  %v718_v32 = vadd.f32 %v1102_v29, %v622_v27  ;;  %v712_v33 = vpop.f32.mrb[15].mxu1 }
 0x491   :  { %v725_v34 = vadd.f32 %v721_v28, %v590_v8  ;;  %v1176_v35 = vpack.c.bf16 %v722_v26, %v721_v28  ;;  %v713_v36 = vadd.f32 %v712_v33, %v617_v30 }
 0x492   :  { %v724_v37 = vmax.f32 %v718_v32, 0.0 }
 0x493   :  { %v723_v38 = vmax.f32 %v713_v36, 0.0  ;;  %1177 = vmatprep.subr.bf16.mxu1 %v1176_v35 }
 0x494   :  { %v728_v39 = vadd.f32 %v724_v37, %v593_v13  ;;  %1179 = vmatpush3.bf16.msra.mxu1 %v1176_v35 }
 0x495   :  { %v727_v40 = vadd.f32 %v723_v38, %v592_v14  ;;  %v1180_v41 = vpack.c.bf16 %v724_v37, %v723_v38 }
 0x497   :  { %1181 = vmatprep.subr.bf16.mxu1 %v1180_v41 }
 0x498   :  { %1183 = vmatpush3.bf16.msra.mxu1 %v1180_v41 }
 0x49b   :  { %1112 = vmatmul.mubr.msk.f32.vlgmr.msra.gmra.mrb[16].mxu1 %vm218_vm1, %v933_v42 }
 0x49c   :  { %1114 = vmatprep.mubr.msk.f32.mxu1 %vm218_vm1, %v934_v43 }
 0x49f   :  { %1115 = vmatmul.mubr.msk.f32.gmra.mrb[18].mxu1 %vm218_vm1, %v935_v44 }
 0x56e   :  { %v1113_v48 = vpop.f32.mrb[16].mxu1 }
 0x56f   :  { %v843_v49 = vadd.f32 %v1113_v48, %v747_v45  ;;  %v837_v50 = vpop.f32.mrb[17].mxu1 }
 0x570   :  { %v838_v51 = vadd.f32 %v837_v50, %v742_v46 }
 0x571   :  { %v857_v52 = vmax.f32 %v843_v49, 0.0 }
 0x572   :  { %v856_v53 = vmax.f32 %v838_v51, 0.0  ;;  %v1116_v54 = vpop.f32.mrb[18].mxu1 }
 0x573   :  { %v861_v56 = vadd.f32 %v857_v52, %v726_v31  ;;  %v853_v57 = vadd.f32 %v1116_v54, %v757_v47  ;;  %v847_v58 = vpop.f32.mrb[19].mxu1 }
 0x574   :  { %v860_v59 = vadd.f32 %v856_v53, %v725_v34  ;;  %v848_v60 = vadd.f32 %v847_v58, %v752_v55 }
 0x575   :  { %v859_v61 = vmax.f32 %v853_v57, 0.0 }
 0x576   :  { %v991_v62 = vpack.c.bf16 %v861_v56, %v860_v59  ;;  %v858_v63 = vmax.f32 %v848_v60, 0.0 }
 0x577   :  { %v863_v0 = vadd.f32 %v859_v61, %v728_v39 }
 0x578   :  { %992 = vst [vmem:[%s1458_s5] sm:$0xff] %v991_v62   ;;  %v862_v1 = vadd.f32 %v858_v63, %v727_v40 }
 0x57a   :  { %v996_v2 = vpack.c.bf16 %v863_v0, %v862_v1 }
 0x57c   :  { %1006 = vst [vmem:[%s1458_s5 + $0x8] sm:$0xff] %v996_v2  }

// kernel: unet_tiny_sum_forward.20
= control target key start
LH: loop header
LB: loop body
LE: loop exit
PB: predicated region body
PF: predicated region fallthrough
CT: control target
= control target key end

     0   :  { %v548_v2 = vmov 0   ;;  %s687_s0 = inlined_call_operand.vmem [shape: bf16[128,128], index: 0, kind: input, shape index: {}]   ;;  %s688_s3 = inlined_call_operand.vmem [shape: f32[64,128], index: 3, kind: input, shape index: {}]   ;;  %s689_s4 = inlined_call_operand.vmem [shape: f32[64,1], index: 4, kind: input, shape index: {}]   ;;  %s690_s1 = inlined_call_operand.vmem [shape: bf16[64,128], index: 1, kind: input, shape index: {}]   ;;  %s691_s2 = inlined_call_operand.vmem [shape: bf16[64,128], index: 2, kind: input, shape index: {}]   ;;  %s692_s5 = inlined_call_operand.vmem [shape: bf16[64,128], index: 5, kind: output, shape index: {}]  }
   0x1   :  { %v330_v0 = vld [vmem:[%s687_s0] sm:$0xff]   ;;  %v413_v1 = vld [vmem:[%s687_s0 + $0x8] sm:$0xff]   ;;  %547 = vset.pattern.permute.xlu1 %v548_v2  ;;  %546 = vset.pattern.permute.xlu0 %v548_v2  ;;  %v414_v5 = vld [vmem:[%s687_s0 + $0x10] sm:$0xff]  }
   0x2   :  { %498 = vmatprep.subr.bf16.mxu0 %v330_v0  ;;  %529 = vmatprep.subr.bf16.mxu1 %v330_v0  ;;  %v20_v3 = vld [vmem:[%s688_s3] sm:$0xff]  ;;  %v62_v6 = vld [vmem:[%s689_s4 + $0x10] sm:$0xff]  ;;  %v415_v8 = vld [vmem:[%s687_s0 + $0x18] sm:$0xff]  }
   0x3   :  { %500 = vmatpush3.bf16.msra.mxu0 %v330_v0  ;;  %537 = vmatpush3.bf16.msra.mxu1 %v330_v0  ;;  %v24_v4 = vld [vmem:[%s688_s3 + $0x20] sm:$0xff]  ;;  %v63_v9 = vld [vmem:[%s689_s4 + $0x18] sm:$0xff]  ;;  %v61_v10 = vld [vmem:[%s689_s4 + $0x8] sm:$0xff] }
   0x4   :  { %502 = vmatprep.subr.bf16.mxu0 %v413_v1  ;;  %530 = vmatprep.subr.bf16.mxu1 %v413_v1  ;;  %v60_v7 = vld [vmem:[%s689_s4] sm:$0xff]  ;;  %v65_v12 = vld [vmem:[%s689_s4 + $0x28] sm:$0xff]  ;;  %v67_v15 = vld [vmem:[%s689_s4 + $0x38] sm:$0xff] }
   0x5   :  { %485 = vmatprep.mubr.f32.mxu0 %v20_v3  ;;  %491 = vmatprep.mubr.f32.mxu1 %v24_v4  ;;  %v416_v11 = vld [vmem:[%s687_s0 + $0x20] sm:$0xff]   ;;  %v417_v14 = vld [vmem:[%s687_s0 + $0x28] sm:$0xff]   ;;  %v66_v16 = vld [vmem:[%s689_s4 + $0x30] sm:$0xff] }
   0x6   :  { %80 = vperm.xlu1 %547, %v62_v6   ;;  %70 = vperm.xlu0 %546, %v60_v7   ;;  %v64_v13 = vld [vmem:[%s689_s4 + $0x20] sm:$0xff]  ;;  %v418_v17 = vld [vmem:[%s687_s0 + $0x30] sm:$0xff]   ;;  %v419_v18 = vld [vmem:[%s687_s0 + $0x38] sm:$0xff]  }
   0x7   :  { %504 = vmatpush3.bf16.msra.mxu0 %v413_v1  ;;  %538 = vmatpush3.bf16.msra.mxu1 %v413_v1  ;;  %v21_v19 = vld [vmem:[%s688_s3 + $0x8] sm:$0xff]  ;;  %v22_v21 = vld [vmem:[%s688_s3 + $0x10] sm:$0xff]  ;;  %v23_v23 = vld [vmem:[%s688_s3 + $0x18] sm:$0xff] }
   0x8   :  { %506 = vmatprep.subr.bf16.mxu0 %v414_v5  ;;  %531 = vmatprep.subr.bf16.mxu1 %v414_v5  ;;  %v25_v20 = vld [vmem:[%s688_s3 + $0x28] sm:$0xff]  ;;  %v26_v22 = vld [vmem:[%s688_s3 + $0x30] sm:$0xff]  ;;  %v27_v24 = vld [vmem:[%s688_s3 + $0x38] sm:$0xff] }
   0x9   :  { %v362_v29 = vld [vmem:[%s690_s1] sm:$0xff]   ;;  %v421_v30 = vld [vmem:[%s690_s1 + $0x10] sm:$0xff]   ;;  %v420_v35 = vld [vmem:[%s690_s1 + $0x8] sm:$0xff]  }
   0xa   :  { %85 = vperm.xlu1 %547, %v63_v9   ;;  %75 = vperm.xlu0 %546, %v61_v10   ;;  %v378_v33 = vld [vmem:[%s691_s2] sm:$0xff]   ;;  %v424_v34 = vld [vmem:[%s691_s2 + $0x10] sm:$0xff]   ;;  %v422_v36 = vld [vmem:[%s690_s1 + $0x18] sm:$0xff]   ;;  %v364_v37 = vunpack.c.h.bf16 %v362_v29  ;;  %v372_v38 = vunpack.c.h.bf16 %v421_v30  ;;  %v363_v39 = vunpack.c.l.bf16 %v362_v29  ;;  %v371_v40 = vunpack.c.l.bf16 %v421_v30 }
   0xb   :  { %508 = vmatpush3.bf16.msra.mxu0 %v414_v5  ;;  %539 = vmatpush3.bf16.msra.mxu1 %v414_v5  ;;  %v380_v42 = vunpack.c.h.bf16 %v378_v33  ;;  %v388_v44 = vunpack.c.h.bf16 %v424_v34  ;;  %v379_v45 = vunpack.c.l.bf16 %v378_v33  ;;  %v387_v46 = vunpack.c.l.bf16 %v424_v34  ;;  %v423_v47 = vld [vmem:[%s691_s2 + $0x8] sm:$0xff]   ;;  %v425_v48 = vld [vmem:[%s691_s2 + $0x18] sm:$0xff]  }
   0xc   :  { %510 = vmatprep.subr.bf16.mxu0 %v415_v8  ;;  %532 = vmatprep.subr.bf16.mxu1 %v415_v8  ;;  %v368_v53 = vunpack.c.h.bf16 %v420_v35  ;;  %v376_v54 = vunpack.c.h.bf16 %v422_v36  ;;  %v367_v57 = vunpack.c.l.bf16 %v420_v35  ;;  %v375_v58 = vunpack.c.l.bf16 %v422_v36 }
   0xd   :  { %v384_v63 = vunpack.c.h.bf16 %v423_v47  ;;  %v392_v0 = vunpack.c.h.bf16 %v425_v48  ;;  %v383_v5 = vunpack.c.l.bf16 %v423_v47  ;;  %v391_v6 = vunpack.c.l.bf16 %v425_v48 }
   0xe   :  { %95 = vperm.xlu1 %547, %v65_v12   ;;  %90 = vperm.xlu0 %546, %v64_v13  }
   0xf   :  { %512 = vmatpush3.bf16.msra.mxu0 %v415_v8  ;;  %540 = vmatpush3.bf16.msra.mxu1 %v415_v8 }
  0x10   :  { %514 = vmatprep.subr.bf16.mxu0 %v416_v11  ;;  %533 = vmatprep.subr.bf16.mxu1 %v416_v11 }
  0x12   :  { %105 = vperm.xlu1 %547, %v67_v15   ;;  %100 = vperm.xlu0 %546, %v66_v16  }
  0x13   :  { %516 = vmatpush3.bf16.msra.mxu0 %v416_v11  ;;  %541 = vmatpush3.bf16.msra.mxu1 %v416_v11 }
  0x14   :  { %518 = vmatprep.subr.bf16.mxu0 %v417_v14  ;;  %534 = vmatprep.subr.bf16.mxu1 %v417_v14 }
  0x17   :  { %520 = vmatpush3.bf16.msra.mxu0 %v417_v14  ;;  %542 = vmatpush3.bf16.msra.mxu1 %v417_v14 }
  0x18   :  { %522 = vmatprep.subr.bf16.mxu0 %v418_v17  ;;  %535 = vmatprep.subr.bf16.mxu1 %v418_v17 }
  0x1b   :  { %524 = vmatpush3.bf16.msra.mxu0 %v418_v17  ;;  %543 = vmatpush3.bf16.msra.mxu1 %v418_v17 }
  0x1c   :  { %526 = vmatprep.subr.bf16.mxu0 %v419_v18  ;;  %536 = vmatprep.subr.bf16.mxu1 %v419_v18 }
  0x1f   :  { %528 = vmatpush3.bf16.msra.mxu0 %v419_v18  ;;  %544 = vmatpush3.bf16.msra.mxu1 %v419_v18 }
  0x22   :  { %486 = vmatmul.mubr.f32.vlgmr.msra.gmra.mrb[0].mxu0 %v21_v19  ;;  %492 = vmatmul.mubr.f32.vlgmr.msra.gmra.mrb[0].mxu1 %v25_v20 }
  0x23   :  { %488 = vmatprep.mubr.f32.mxu0 %v22_v21  ;;  %494 = vmatprep.mubr.f32.mxu1 %v26_v22 }
  0x26   :  { %489 = vmatmul.mubr.f32.gmra.mrb[2].mxu0 %v23_v23  ;;  %495 = vmatmul.mubr.f32.gmra.mrb[2].mxu1 %v27_v24 }
  0x85   :  { %v81_v25 = vpop.permute.xlu1 %80  ;;  %v71_v26 = vpop.permute.xlu0 %70 }
  0x89   :  { %v86_v27 = vpop.permute.xlu1 %85  ;;  %v76_v28 = vpop.permute.xlu0 %75 }
  0x8d   :  { %v96_v31 = vpop.permute.xlu1 %95  ;;  %v91_v32 = vpop.permute.xlu0 %90 }
  0x91   :  { %v106_v59 = vpop.permute.xlu1 %105  ;;  %v101_v60 = vpop.permute.xlu0 %100 }
  0xf5   :  { %v487_v41 = vpop.f32.mrb[0].mxu0  ;;  %v493_v43 = vpop.f32.mrb[0].mxu1 }
  0xf6   :  { %v180_v49 = vadd.f32 %v487_v41, %v76_v28  ;;  %v200_v50 = vadd.f32 %v493_v43, %v96_v31  ;;  %v174_v51 = vpop.f32.mrb[1].mxu0  ;;  %v194_v52 = vpop.f32.mrb[1].mxu1 }
  0xf7   :  { %v175_v55 = vadd.f32 %v174_v51, %v71_v26  ;;  %v195_v56 = vadd.f32 %v194_v52, %v91_v32 }
  0xf8   :  { %v214_v61 = vmax.f32 %v180_v49, 0.0  ;;  %v218_v62 = vmax.f32 %v200_v50, 0.0 }
  0xf9   :  { %v213_v1 = vmax.f32 %v175_v55, 0.0  ;;  %v217_v2 = vmax.f32 %v195_v56, 0.0  ;;  %v490_v3 = vpop.f32.mrb[2].mxu0  ;;  %v496_v4 = vpop.f32.mrb[2].mxu1 }
  0xfa   :  { %v238_v7 = vmul.f32 %v364_v37, %v214_v61  ;;  %v242_v8 = vmul.f32 %v372_v38, %v218_v62  ;;  %v190_v9 = vadd.f32 %v490_v3, %v86_v27  ;;  %v210_v10 = vadd.f32 %v496_v4, %v106_v59  ;;  %v184_v11 = vpop.f32.mrb[3].mxu0  ;;  %v204_v12 = vpop.f32.mrb[3].mxu1 }
  0xfb   :  { %v237_v13 = vmul.f32 %v363_v39, %v213_v1  ;;  %v241_v14 = vmul.f32 %v371_v40, %v217_v2  ;;  %v185_v15 = vadd.f32 %v184_v11, %v81_v25  ;;  %v205_v16 = vadd.f32 %v204_v12, %v101_v60 }
  0xfc   :  { %v262_v17 = vadd.f32 %v380_v42, %v238_v7  ;;  %v266_v18 = vadd.f32 %v388_v44, %v242_v8  ;;  %v216_v19 = vmax.f32 %v190_v9, 0.0  ;;  %v220_v20 = vmax.f32 %v210_v10, 0.0 }
  0xfd   :  { %v261_v21 = vadd.f32 %v379_v45, %v237_v13  ;;  %v265_v22 = vadd.f32 %v387_v46, %v241_v14  ;;  %v215_v23 = vmax.f32 %v185_v15, 0.0  ;;  %v219_v24 = vmax.f32 %v205_v16, 0.0 }
  0xfe   :  { %v240_v26 = vmul.f32 %v368_v53, %v216_v19  ;;  %v244_v28 = vmul.f32 %v376_v54, %v220_v20 }
  0xff   :  { %v396_v29 = vpack.c.bf16 %v262_v17, %v261_v21  ;;  %v406_v30 = vpack.c.bf16 %v266_v18, %v265_v22  ;;  %v239_v27 = vmul.f32 %v367_v57, %v215_v23  ;;  %v243_v31 = vmul.f32 %v375_v58, %v219_v24 }
 0x100   :  { %v264_v32 = vadd.f32 %v384_v63, %v240_v26  ;;  %v268_v33 = vadd.f32 %v392_v0, %v244_v28 }
 0x101   :  { %397 = vst [vmem:[%s692_s5] sm:$0xff] %v396_v29   ;;  %427 = vst [vmem:[%s692_s5 + $0x10] sm:$0xff] %v406_v30   ;;  %v263_v25 = vadd.f32 %v383_v5, %v239_v27  ;;  %v267_v34 = vadd.f32 %v391_v6, %v243_v31 }
 0x103   :  { %v401_v35 = vpack.c.bf16 %v264_v32, %v263_v25  ;;  %v411_v36 = vpack.c.bf16 %v268_v33, %v267_v34 }
 0x105   :  { %426 = vst [vmem:[%s692_s5 + $0x8] sm:$0xff] %v401_v35   ;;  %428 = vst [vmem:[%s692_s5 + $0x18] sm:$0xff] %v411_v36  }

// kernel: tile.18
= control target key start
LH: loop header
LB: loop body
LE: loop exit
PB: predicated region body
PF: predicated region fallthrough
CT: control target
= control target key end

     0   :  { %s22_s0 = inlined_call_operand.vmem [shape: f32[8], index: 0, kind: input, shape index: {}]   ;;  %s23_s1 = inlined_call_operand.vmem [shape: f32[4,1,1,8], index: 1, kind: output, shape index: {}]  }
   0x1   :  { %v4_v0 = vld [vmem:[%s22_s0] ss:$0 sm:$0xff] }
   0x2   :  { %5 = vst [vmem:[%s23_s1] sm:$0xf] %v4_v0 }

// kernel: tile.1
= control target key start
LH: loop header
LB: loop body
LE: loop exit
PB: predicated region body
PF: predicated region fallthrough
CT: control target
= control target key end

     0   :  { %s66_s8 = smov 125   ;;  %vm7_vm0 = vcmask 7168   ;;  %s67_s11 = smov 126   ;;  %s117_s0 = inlined_call_operand.vmem [shape: f32[4,1,1,8], index: 0, kind: input, shape index: {}]   ;;  %s118_s1 = inlined_call_operand.vmem [shape: f32[32,1], index: 1, kind: output, shape index: {}]  }
   0x1   :  { %v4_v0 = vld [vmem:[%s117_s0] sm:$0xf]  ;;  %s65_s0 = smov 127   ;;  %s68_s12 = smov 124  }
   0x2   :  { %5 = vst [vmem:[#allocation0] sm:$0xf] %v4_v0  ;;  %s69_s13 = smov 123   ;;  %s70_s14 = smov 122  }
   0x3   :  { %s71_s15 = smov 121  }
   0x9   :  { %v9_v1 = vld [vmem:[#allocation0] sm:$0xf]  }
   0xa   :  { %v21_v2 = vld [vmem:[#allocation0] sm:$0xf]   ;;  %10 = vrot.lane.b32.xlu0 %v9_v1, %s65_s0 }
   0xb   :  { %22 = vrot.lane.b32.xlu1 %v21_v2, %s66_s8  ;;  %v15_v3 = vld [vmem:[#allocation0] sm:$0xf]  }
   0xc   :  { %v27_v4 = vld [vmem:[#allocation0] sm:$0xf]  }
   0xd   :  { %v6_v5 = vld [vmem:[#allocation0] sm:$0xf]  }
   0xe   :  { %8 = vst.msk [vmem:[%s118_s1] ss:$8 sm:$0xf] %vm7_vm0, %v6_v5   ;;  %16 = vrot.lane.b32.xlu0 %v15_v3, %s67_s11  ;;  %v33_v6 = vld [vmem:[#allocation0] sm:$0xf]  }
   0xf   :  { %28 = vrot.lane.b32.xlu1 %v27_v4, %s68_s12  ;;  %v39_v7 = vld [vmem:[#allocation0] sm:$0xf]  }
  0x10   :  { %v45_v8 = vld [vmem:[#allocation0] sm:$0xf]  }
  0x12   :  { %34 = vrot.lane.b32.xlu0 %v33_v6, %s69_s13 }
  0x13   :  { %40 = vrot.lane.b32.xlu1 %v39_v7, %s70_s14 }
  0x16   :  { %46 = vrot.lane.b32.xlu0 %v45_v8, %s71_s15 }
  0x7c   :  { %v11_v9 = vpop.permute.xlu0 %10  }
  0x7d   :  { %v23_v10 = vpop.permute.xlu1 %22   ;;  %51 = vst.msk [vmem:[%s118_s1 + $0x1] ss:$8 sm:$0xf] %vm7_vm0, %v11_v9  }
  0x7e   :  { %53 = vst.msk [vmem:[%s118_s1 + $0x3] ss:$8 sm:$0xf] %vm7_vm0, %v23_v10  }
  0x80   :  { %v17_v11 = vpop.permute.xlu0 %16  }
  0x81   :  { %v29_v12 = vpop.permute.xlu1 %28   ;;  %52 = vst.msk [vmem:[%s118_s1 + $0x2] ss:$8 sm:$0xf] %vm7_vm0, %v17_v11  }
  0x82   :  { %54 = vst.msk [vmem:[%s118_s1 + $0x4] ss:$8 sm:$0xf] %vm7_vm0, %v29_v12  }
  0x84   :  { %v35_v13 = vpop.permute.xlu0 %34  }
  0x85   :  { %v41_v14 = vpop.permute.xlu1 %40   ;;  %55 = vst.msk [vmem:[%s118_s1 + $0x5] ss:$8 sm:$0xf] %vm7_vm0, %v35_v13  }
  0x86   :  { %56 = vst.msk [vmem:[%s118_s1 + $0x6] ss:$8 sm:$0xf] %vm7_vm0, %v41_v14  }
  0x88   :  { %v47_v15 = vpop.permute.xlu0 %46  }
  0x89   :  { %57 = vst.msk [vmem:[%s118_s1 + $0x7] ss:$8 sm:$0xf] %vm7_vm0, %v47_v15  }

// kernel: unet_tiny_sum_forward.22
= control target key start
LH: loop header
LB: loop body
LE: loop exit
PB: predicated region body
PF: predicated region fallthrough
CT: control target
= control target key end

     0   :  { %v335_v2 = vmov 0   ;;  %vm64_vm0 = vcmask 523264   ;;  %s424_s0 = inlined_call_operand.vmem [shape: bf16[64,128], index: 0, kind: input, shape index: {}]   ;;  %s425_s3 = inlined_call_operand.vmem [shape: f32[32,64], index: 3, kind: input, shape index: {}]   ;;  %s426_s4 = inlined_call_operand.vmem [shape: f32[32,1], index: 4, kind: input, shape index: {}]   ;;  %s427_s1 = inlined_call_operand.vmem [shape: bf16[32,128], index: 1, kind: input, shape index: {}]   ;;  %s428_s2 = inlined_call_operand.vmem [shape: bf16[32,128], index: 2, kind: input, shape index: {}]   ;;  %s429_s5 = inlined_call_operand.vmem [shape: bf16[32,128], index: 5, kind: output, shape index: {}]  }
   0x1   :  { %v227_v0 = vld [vmem:[%s424_s0] sm:$0xff]   ;;  %v268_v1 = vld [vmem:[%s424_s0 + $0x8] sm:$0xff]   ;;  %334 = vset.pattern.permute.xlu1 %v335_v2  ;;  %333 = vset.pattern.permute.xlu0 %v335_v2  ;;  %v22_v4 = vld [vmem:[%s425_s3 + $0x10] sm:$0xff] }
   0x2   :  { %309 = vmatprep.subr.bf16.mxu0 %v227_v0  ;;  %324 = vmatprep.subr.bf16.mxu1 %v227_v0  ;;  %v20_v3 = vld [vmem:[%s425_s3] sm:$0xff]  ;;  %v42_v5 = vld [vmem:[%s426_s4 + $0x10] sm:$0xff]  ;;  %v43_v8 = vld [vmem:[%s426_s4 + $0x18] sm:$0xff] }
   0x3   :  { %311 = vmatpush3.bf16.msra.mxu0 %v227_v0  ;;  %328 = vmatpush3.bf16.msra.mxu1 %v227_v0  ;;  %v40_v6 = vld [vmem:[%s426_s4] sm:$0xff]  ;;  %v269_v7 = vld [vmem:[%s424_s0 + $0x10] sm:$0xff]   ;;  %v41_v9 = vld [vmem:[%s426_s4 + $0x8] sm:$0xff] }
   0x4   :  { %313 = vmatprep.subr.bf16.mxu0 %v268_v1  ;;  %325 = vmatprep.subr.bf16.mxu1 %v268_v1  ;;  %v270_v10 = vld [vmem:[%s424_s0 + $0x18] sm:$0xff]   ;;  %v21_v11 = vld [vmem:[%s425_s3 + $0x8] sm:$0xff]  ;;  %v243_v15 = vld [vmem:[%s427_s1] sm:$0xff]  }
   0x5   :  { %302 = vmatprep.mubr.msk.f32.mxu0 %vm64_vm0, %v20_v3  ;;  %305 = vmatprep.mubr.msk.f32.mxu1 %vm64_vm0, %v22_v4  ;;  %v23_v12 = vld [vmem:[%s425_s3 + $0x18] sm:$0xff]  ;;  %v271_v16 = vld [vmem:[%s427_s1 + $0x8] sm:$0xff]   ;;  %v251_v20 = vld [vmem:[%s428_s2] sm:$0xff]   ;;  %v245_v24 = vunpack.c.h.bf16 %v243_v15  ;;  %v244_v30 = vunpack.c.l.bf16 %v243_v15 }
   0x6   :  { %56 = vperm.xlu1 %334, %v42_v5   ;;  %46 = vperm.xlu0 %333, %v40_v6   ;;  %v272_v22 = vld [vmem:[%s428_s2 + $0x8] sm:$0xff]   ;;  %v249_v26 = vunpack.c.h.bf16 %v271_v16  ;;  %v248_v32 = vunpack.c.l.bf16 %v271_v16  ;;  %v253_v34 = vunpack.c.h.bf16 %v251_v20  ;;  %v252_v38 = vunpack.c.l.bf16 %v251_v20 }
   0x7   :  { %315 = vmatpush3.bf16.msra.mxu0 %v268_v1  ;;  %329 = vmatpush3.bf16.msra.mxu1 %v268_v1  ;;  %v257_v36 = vunpack.c.h.bf16 %v272_v22  ;;  %v256_v40 = vunpack.c.l.bf16 %v272_v22 }
   0x8   :  { %317 = vmatprep.subr.bf16.mxu0 %v269_v7  ;;  %326 = vmatprep.subr.bf16.mxu1 %v269_v7 }
   0xa   :  { %61 = vperm.xlu1 %334, %v43_v8   ;;  %51 = vperm.xlu0 %333, %v41_v9  }
   0xb   :  { %319 = vmatpush3.bf16.msra.mxu0 %v269_v7  ;;  %330 = vmatpush3.bf16.msra.mxu1 %v269_v7 }
   0xc   :  { %321 = vmatprep.subr.bf16.mxu0 %v270_v10  ;;  %327 = vmatprep.subr.bf16.mxu1 %v270_v10 }
   0xf   :  { %323 = vmatpush3.bf16.msra.mxu0 %v270_v10  ;;  %331 = vmatpush3.bf16.msra.mxu1 %v270_v10 }
  0x12   :  { %303 = vmatmul.mubr.msk.f32.vlgmr.msra.gmra.mrb[0].mxu0 %vm64_vm0, %v21_v11  ;;  %306 = vmatmul.mubr.msk.f32.vlgmr.msra.gmra.mrb[0].mxu1 %vm64_vm0, %v23_v12 }
  0x85   :  { %v57_v13 = vpop.permute.xlu1 %56  ;;  %v47_v14 = vpop.permute.xlu0 %46 }
  0x89   :  { %v62_v17 = vpop.permute.xlu1 %61  ;;  %v52_v18 = vpop.permute.xlu0 %51 }
  0xe5   :  { %v304_v19 = vpop.f32.mrb[0].mxu0  ;;  %v307_v21 = vpop.f32.mrb[0].mxu1 }
  0xe6   :  { %v149_v23 = vadd.f32 %v304_v19, %v52_v18  ;;  %v159_v25 = vadd.f32 %v307_v21, %v62_v17  ;;  %v143_v27 = vpop.f32.mrb[1].mxu0  ;;  %v153_v28 = vpop.f32.mrb[1].mxu1 }
  0xe7   :  { %v144_v29 = vadd.f32 %v143_v27, %v47_v14  ;;  %v154_v31 = vadd.f32 %v153_v28, %v57_v13 }
  0xe8   :  { %v163_v33 = vmax.f32 %v149_v23, 0.0  ;;  %v165_v35 = vmax.f32 %v159_v25, 0.0 }
  0xe9   :  { %v162_v37 = vmax.f32 %v144_v29, 0.0  ;;  %v164_v39 = vmax.f32 %v154_v31, 0.0 }
  0xea   :  { %v175_v41 = vmul.f32 %v245_v24, %v163_v33  ;;  %v177_v42 = vmul.f32 %v249_v26, %v165_v35 }
  0xeb   :  { %v174_v43 = vmul.f32 %v244_v30, %v162_v37  ;;  %v176_v44 = vmul.f32 %v248_v32, %v164_v39 }
  0xec   :  { %v187_v45 = vadd.f32 %v253_v34, %v175_v41  ;;  %v189_v46 = vadd.f32 %v257_v36, %v177_v42 }
  0xed   :  { %v186_v47 = vadd.f32 %v252_v38, %v174_v43  ;;  %v188_v48 = vadd.f32 %v256_v40, %v176_v44 }
  0xef   :  { %v261_v49 = vpack.c.bf16 %v187_v45, %v186_v47  ;;  %v266_v50 = vpack.c.bf16 %v189_v46, %v188_v48 }
  0xf1   :  { %262 = vst [vmem:[%s429_s5] sm:$0xff] %v261_v49   ;;  %273 = vst [vmem:[%s429_s5 + $0x8] sm:$0xff] %v266_v50  }

// kernel: tile.22
= control target key start
LH: loop header
LB: loop body
LE: loop exit
PB: predicated region body
PF: predicated region fallthrough
CT: control target
= control target key end

     0   :  { %s22_s0 = inlined_call_operand.vmem [shape: f32[4], index: 0, kind: input, shape index: {}]   ;;  %s23_s1 = inlined_call_operand.vmem [shape: f32[4,1,1,4], index: 1, kind: output, shape index: {}]  }
   0x1   :  { %v4_v0 = vld [vmem:[%s22_s0] ss:$0 sm:$0xff] }
   0x2   :  { %5 = vst [vmem:[%s23_s1] sm:$0xf] %v4_v0 }

// kernel: tile.2
= control target key start
LH: loop header
LB: loop body
LE: loop exit
PB: predicated region body
PF: predicated region fallthrough
CT: control target
= control target key end

     0   :  { %s34_s8 = smov 125   ;;  %vm7_vm0 = vcmask 7168   ;;  %s35_s11 = smov 126   ;;  %s61_s0 = inlined_call_operand.vmem [shape: f32[4,1,1,4], index: 0, kind: input, shape index: {}]   ;;  %s62_s1 = inlined_call_operand.vmem [shape: f32[16,1], index: 1, kind: output, shape index: {}]  }
   0x1   :  { %v4_v0 = vld [vmem:[%s61_s0] sm:$0xf]  ;;  %s33_s0 = smov 127  }
   0x2   :  { %5 = vst [vmem:[#allocation0] sm:$0xf] %v4_v0 }
   0x9   :  { %v9_v1 = vld [vmem:[#allocation0] sm:$0xf]  }
   0xa   :  { %v21_v2 = vld [vmem:[#allocation0] sm:$0xf]   ;;  %10 = vrot.lane.b32.xlu0 %v9_v1, %s33_s0 }
   0xb   :  { %22 = vrot.lane.b32.xlu1 %v21_v2, %s34_s8  ;;  %v6_v3 = vld [vmem:[#allocation0] sm:$0xf]  }
   0xc   :  { %v15_v4 = vld [vmem:[#allocation0] sm:$0xf]   ;;  %8 = vst.msk [vmem:[%s62_s1] ss:$4 sm:$0xf] %vm7_vm0, %v6_v3  }
   0xe   :  { %16 = vrot.lane.b32.xlu0 %v15_v4, %s35_s11 }
  0x7c   :  { %v11_v5 = vpop.permute.xlu0 %10  }
  0x7d   :  { %v23_v6 = vpop.permute.xlu1 %22   ;;  %27 = vst.msk [vmem:[%s62_s1 + $0x1] ss:$4 sm:$0xf] %vm7_vm0, %v11_v5  }
  0x7e   :  { %29 = vst.msk [vmem:[%s62_s1 + $0x3] ss:$4 sm:$0xf] %vm7_vm0, %v23_v6  }
  0x80   :  { %v17_v7 = vpop.permute.xlu0 %16  }
  0x81   :  { %28 = vst.msk [vmem:[%s62_s1 + $0x2] ss:$4 sm:$0xf] %vm7_vm0, %v17_v7  }

// kernel: unet_tiny_sum_forward.24
= control target key start
LH: loop header
LB: loop body
LE: loop exit
PB: predicated region body
PF: predicated region fallthrough
CT: control target
= control target key end

     0   :  { %vm42_vm0 = vcmask 261120   ;;  %v207_v3 = vmov 0   ;;  %s267_s0 = inlined_call_operand.vmem [shape: bf16[32,128], index: 0, kind: input, shape index: {}]   ;;  %s268_s3 = inlined_call_operand.vmem [shape: f32[16,32], index: 3, kind: input, shape index: {}]   ;;  %s269_s4 = inlined_call_operand.vmem [shape: f32[16,1], index: 4, kind: input, shape index: {}]   ;;  %s270_s1 = inlined_call_operand.vmem [shape: bf16[16,128], index: 1, kind: input, shape index: {}]   ;;  %s271_s2 = inlined_call_operand.vmem [shape: bf16[16,128], index: 2, kind: input, shape index: {}]   ;;  %s272_s5 = inlined_call_operand.vmem [shape: bf16[16,128], index: 5, kind: output, shape index: {}]  }
   0x1   :  { %v159_v0 = vld [vmem:[%s267_s0] sm:$0xff]   ;;  %v179_v1 = vld [vmem:[%s267_s0 + $0x8] sm:$0xff]   ;;  %206 = vset.pattern.permute.xlu0 %v207_v3 }
   0x2   :  { %v20_v2 = vld [vmem:[%s268_s3] sm:$0xff]  ;;  %198 = vmatprep.subr.bf16.mxu0 %v159_v0  ;;  %v31_v5 = vld [vmem:[%s269_s4 + $0x8] sm:$0xff] }
   0x3   :  { %194 = vmatprep.mubr.msk.f32.mxu0 %vm42_vm0, %v20_v2  ;;  %v30_v4 = vld [vmem:[%s269_s4] sm:$0xff]  ;;  %200 = vmatpush3.bf16.msra.mxu0 %v159_v0  ;;  %v21_v6 = vld [vmem:[%s268_s3 + $0x8] sm:$0xff] }
   0x4   :  { %34 = vperm.xlu0 %206, %v30_v4   ;;  %202 = vmatprep.subr.bf16.mxu0 %v179_v1  ;;  %v167_v8 = vld [vmem:[%s270_s1] sm:$0xff]  }
   0x5   :  { %v171_v11 = vld [vmem:[%s271_s2] sm:$0xff]   ;;  %v169_v13 = vunpack.c.h.bf16 %v167_v8  ;;  %v168_v16 = vunpack.c.l.bf16 %v167_v8 }
   0x6   :  { %v173_v18 = vunpack.c.h.bf16 %v171_v11  ;;  %v172_v20 = vunpack.c.l.bf16 %v171_v11 }
   0x7   :  { %204 = vmatpush3.bf16.msra.mxu0 %v179_v1 }
   0x8   :  { %39 = vperm.xlu0 %206, %v31_v5  }
   0xa   :  { %195 = vmatmul.mubr.msk.f32.vlgmr.msra.gmra.mrb[0].mxu0 %vm42_vm0, %v21_v6 }
  0x83   :  { %v35_v7 = vpop.permute.xlu0 %34 }
  0x87   :  { %v40_v9 = vpop.permute.xlu0 %39 }
  0xdd   :  { %v196_v10 = vpop.f32.mrb[0].mxu0 }
  0xde   :  { %v121_v12 = vadd.f32 %v196_v10, %v40_v9  ;;  %v115_v14 = vpop.f32.mrb[1].mxu0 }
  0xdf   :  { %v116_v15 = vadd.f32 %v115_v14, %v35_v7 }
  0xe0   :  { %v125_v17 = vmax.f32 %v121_v12, 0.0 }
  0xe1   :  { %v124_v19 = vmax.f32 %v116_v15, 0.0 }
  0xe2   :  { %v131_v21 = vmul.f32 %v169_v13, %v125_v17 }
  0xe3   :  { %v130_v22 = vmul.f32 %v168_v16, %v124_v19 }
  0xe4   :  { %v137_v23 = vadd.f32 %v173_v18, %v131_v21 }
  0xe5   :  { %v136_v24 = vadd.f32 %v172_v20, %v130_v22 }
  0xe7   :  { %v177_v25 = vpack.c.bf16 %v137_v23, %v136_v24 }
  0xe9   :  { %178 = vst [vmem:[%s272_s5] sm:$0xff] %v177_v25  }

// kernel: unet_tiny_sum_forward.25
= control target key start
LH: loop header
LB: loop body
LE: loop exit
PB: predicated region body
PF: predicated region fallthrough
CT: control target
= control target key end

     0   :  { %s668_s18 = smov 0   ;;  %s670_s19 = smov 0   ;;  %s736_s0 = inlined_call_operand.vmem [shape: bf16[36,512], index: 0, kind: input, shape index: {}]   ;;  %s737_s1 = inlined_call_operand.vmem [shape: f32[4,36], index: 1, kind: input, shape index: {}]   ;;  %s738_s2 = inlined_call_operand.vmem [shape: f32[4,1], index: 2, kind: input, shape index: {}]   ;;  %s739_s3 = inlined_call_operand.vmem [shape: f32[2,4], index: 3, kind: input, shape index: {}]   ;;  %s740_s4 = inlined_call_operand.vmem [shape: f32[2,1], index: 4, kind: input, shape index: {}]   ;;  %s741_s5 = inlined_call_operand.vmem [shape: f32[2,512], index: 5, kind: output, shape index: {}]  }
   0x1   :  { %s672_s20 = smov 0  }
   0x2 LB: > { %s546_s21 = sadd.s32 4294967295, %s634_s20   ;;  %s685_s22 = sadd.s32 1, %s634_s20   ;;  %s634_s20 = sphi %s672_s20, %s744_s20   ;;  %s630_s19 = sphi %s670_s19, %s743_s19   ;;  %s626_s18 = sphi %s668_s18, %s742_s18  }
   0x3   : > { %s19_s23 = ssub.s32 %s634_s20, %s685_s22  ;;  %s22_s24 = sadd.s32 1, %s630_s19 }
   0x4   : > { %p20_p0 = scmp.eq.s32.totalorder %s19_s23, 0  ;;  %p29_p1 = scmp.ne.s32.totalorder %s630_s19, %s626_s18 }
   0x5   : > { %p30_p2 = scmp.eq.s32.totalorder %s634_s20, 0  ;;  %p549_p4 = scmp.ge.s32.totalorder %s634_s20, 2 }
   0x6   : > { %s694_s25 = scalar_select %p20_p0, %s630_s19, %s22_s24  }
   0x7   : > { %p31_p3 = por %p30_p2, %p29_p1  ;;  %177 = sbr.rel (%p549_p4) target bundleno = 21 (0x15), region = 32 }
   0xe   : > { %180 = sbr.rel (!%p31_p3) target bundleno = 21 (0x15), region = 36  ;;  %s182_s26 = sand.u32 (%p31_p3), 1, %s630_s19  }
   0xf   : > { %s564_s27 = sshll.u32 (%p31_p3), %s634_s20, 3  ;;  %s577_s28 = smul.u32 (%p31_p3), 40, %s182_s26 }
  0x10   : > { %s187_s6 = scalar_lea.vmem (%p31_p3), %s736_s0, %s564_s27 }
  0x11   : > { %v223_v0 = vld [vmem:[%s187_s6] sm:$0xff] (%p31_p3)  ;;  %v225_v1 = vld [vmem:[%s187_s6 + $0x10] sm:$0xff] (%p31_p3)  ;;  %s184_s7 = scalar_lea.vmem (%p31_p3), [#allocation2], %s577_s28 }
  0x12   : > { %v227_v2 = vld [vmem:[%s187_s6 + $0x20] sm:$0xff] (%p31_p3)  ;;  %v229_v3 = vld [vmem:[%s187_s6 + $0x30] sm:$0xff] (%p31_p3)  ;;  %224 = vst [vmem:[%s184_s7] sm:$0xff] (%p31_p3), %v223_v0  ;;  %226 = vst [vmem:[%s184_s7 + $0x8] sm:$0xff] (%p31_p3), %v225_v1 }
  0x13   : > { %v231_v4 = vld [vmem:[%s187_s6 + $0x40] sm:$0xff] (%p31_p3)  ;;  %228 = vst [vmem:[%s184_s7 + $0x10] sm:$0xff] (%p31_p3), %v227_v2  ;;  %230 = vst [vmem:[%s184_s7 + $0x18] sm:$0xff] (%p31_p3), %v229_v3 }
  0x14   : > { %232 = vst [vmem:[%s184_s7 + $0x20] sm:$0xff] (%p31_p3), %v231_v4 }
  0x15 PF: > { %p552_p5 = scmp.ge.s32.totalorder %s634_s20, 1  ;;  %p237_p6 = scmp.lt.s32.totalorder %s634_s20, 3 }
  0x17   : > { %p238_p7 = pnand %p552_p5, %p237_p6 }
  0x18   : > { %s244_s8 = sand.u32 (!%p238_p7), 1, %s626_s18   ;;  %v636_v5 = vmov (!%p238_p7), 0.0   ;;  %v294_v6 = vld [vmem:[%s738_s2] sm:$0xf] (!%p238_p7)  ;;  %v637_v7 = vmov (!%p238_p7), 0   ;;  %vm304_vm0 = vcmask (!%p238_p7), 1043456  }
  0x19   : > { %241 = sbr.rel (%p238_p7) target bundleno = 477 (0x1dd), region = 74  ;;  %375 = vmatprep.mubr.f32.mxu0 (!%p238_p7), %v636_v5  ;;  %465 = vmatprep.mubr.f32.mxu1 (!%p238_p7), %v636_v5  ;;  %v385_v8 = vld [vmem:[%s740_s4] sm:$0x3] (!%p238_p7)  ;;  %vm300_vm1 = vcmask (!%p238_p7), 293888   ;;  %vm391_vm2 = vcmask (!%p238_p7), 31744   ;;  %s553_s23 = sshll.u32 (!%p238_p7), %s546_s21, 1 }
  0x1a   : > { %s578_s9 = smul.u32 (!%p238_p7), 40, %s244_s8  ;;  %605 = vset.pattern.permute.xlu0 (!%p238_p7), %v637_v7  ;;  %v278_v16 = vld [vmem:[%s737_s1] sm:$0xf] (!%p238_p7)  ;;  %p273_p8 = scmp.lt.s32.totalorder (!%p238_p7), %s553_s23, 3 }
  0x1b   : > { %297 = vperm.xlu0 (!%p238_p7), %605, %v294_v6   ;;  %v384_v24 = vld [vmem:[%s739_s3] sm:$0x3] (!%p238_p7) }
  0x1c   : > { %s246_s14 = scalar_lea.vmem (!%p238_p7), [#allocation2], %s578_s9 }
  0x1d   : > { %v606_v9 = vld [vmem:[%s246_s14 + $0x4] ss:$8 sps:$4 sm:$0xff] (!%p238_p7)   ;;  %v608_v10 = vld [vmem:[%s246_s14] ss:$8 sps:$4 sm:$0xff] (!%p238_p7)   ;;  %v609_v11 = vld [vmem:[%s246_s14 + $0x14] ss:$8 sps:$4 sm:$0xff] (!%p238_p7)  }
  0x1e   : > { %566 = vmatprep.subr.bf16.mxu0 (!%p238_p7), %v606_v9  ;;  %v283_v12 = vld [vmem:[%s246_s14 + $0x20] sm:$0x33] (!%p238_p7)  ;;  %v611_v13 = vld [vmem:[%s246_s14 + $0x10] ss:$8 sps:$4 sm:$0xff] (!%p238_p7)  }
  0x1f   : > { %568 = vmatpush1.bf16.msra.mxu0 (!%p238_p7), %v608_v10  ;;  %388 = vperm.xlu0 (!%p238_p7), %605, %v385_v8   ;;  %v293_v14 = vunpack.c.h.bf16 (!%p238_p7), %v283_v12  ;;  %v292_v15 = vunpack.c.l.bf16 (!%p238_p7), %v283_v12 }
  0x20   : > { %570 = vmatprep.subr.bf16.mxu0 %v609_v11  ;;  %s746_s23 = smov (!%p273_p8, %s553_s23), 3 }
  0x21   : > { %s554_s24 = sshll.u32 %s746_s23, 1 }
  0x22   : > { %s276_s28 = scalar_lea.vmem %s741_s5, %s554_s24 }
  0x23   : > { %572 = vmatpush1.bf16.msra.mxu0 %v611_v13 }
  0x24   : > { %555 = vmatprep.subr.msk.mxu0 %vm304_vm0, %v293_v14 }
  0x27   : > { %556 = vmatpush1.msk.msra.mxu0 %vm304_vm0, %v292_v15 }
  0x28   : > { %557 = vmatmul.mubr.msk.f32.vlgmr.msra.gmra.mrb[0].mxu0 %vm300_vm1, %v278_v16 }
  0x9a   : > { %v298_v17 = vpop.permute.xlu0 %297 }
  0x9e   : > { %v389_v25 = vpop.permute.xlu0 %388 }
  0xfb   : > { %v377_v18 = vpop.f32.mrb[0].mxu0 }
  0xfc   : > { %v378_v19 = vadd.f32 %v377_v18, %v298_v17  ;;  %v379_v20 = vpop.f32.mrb[1].mxu0 }
  0xfd   : > { %v380_v21 = vadd.f32 %v379_v20, %v298_v17 }
  0xfe   : > { %v382_v23 = vmax.f32 %v378_v19, 0.0 }
  0xff   : > { %v383_v22 = vmax.f32 %v380_v21, 0.0 }
 0x101   : > { %558 = vmatprep.subr.msk.mxu1 %vm304_vm0, %v383_v22 }
 0x102   : > { %559 = vmatpush1.msk.msra.mxu1 %vm304_vm0, %v382_v23 }
 0x103   : > { %560 = vmatmul.mubr.msk.f32.vlgmr.msra.gmra.mrb[0].mxu1 %vm391_vm2, %v384_v24 }
 0x1d6   : > { %v467_v26 = vpop.f32.mrb[0].mxu1 }
 0x1d7   : > { %v468_v27 = vadd.f32 %v467_v26, %v389_v25  ;;  %v469_v28 = vpop.f32.mrb[1].mxu1 }
 0x1d8   : > { %v470_v29 = vadd.f32 %v469_v28, %v389_v25 }
 0x1da   : > { %v474_v30 = vcombine.low %v468_v27, %v470_v29 }
 0x1dc   : > { %561 = vst.sshfl [vmem:[%s276_s28] sm:$0x33 pattern:$0x76325410] %v474_v30 }
 0x1dd PF: > { %p12_p9 = scmp.ge.s32.totalorder %s685_s22, 4   ;;  %s742_s18 = smov %s630_s19 }
 0x1de   : > { %s743_s19 = smov %s694_s25  ;;  %s744_s20 = smov %s685_s22 }
 0x1df   :  { %14 = sbr.rel (!%p12_p9) target bundleno = 2 (0x2), region = 113 }

</bundles_post_ra>
